<compile_context>
chip_gen: v7x
topology: tpu7x:2x2x1
jax: 0.10.0
libtpu: 0.0.40
codegen_flags: <defaults>
</compile_context>

<pallas_src>
import functools

import jax
import jax.numpy as jnp
from jax.experimental import pallas as pl
from jax.experimental.pallas import tpu as pltpu


# --------------------------- Fused LSTM + FC kernel ---------------------------
def _lstm_model_kernel(x_ref, wih0_ref, wbig_ref, bbig_ref, wfc_ref, bfc_ref,
                       out_ref, *, seq, batch_p, hidden, num_layers):
    """Fused stacked-LSTM + FC forward (wavefront over layers, unrolled over time).

    x_ref    : (T*Bp, Din)   time-major flattened input, batch padded to Bp
    wih0_ref : (Din, 4H)     layer-0 input projection weight
    wbig_ref : (L*H, L*4H)   block bi-diagonal recurrent weight:
                               col-block l: row-block l   = Whh_l
                                            row-block l-1 = Wih_l   (l >= 1)
    bbig_ref : (1, L*4H)     per-layer gate biases (b_ih + b_hh) for all layers
    wfc_ref  : (H, C)        fc weight;  bfc_ref: (1, C) fc bias
    out_ref  : (L*Bp, C)     fc(h_n.view(-1, H)); output dropout is identity in eval
    """
    T, Bp, H, L = seq, batch_p, hidden, num_layers
    G = 4 * H

    # Hoisted layer-0 input projection: ONE lane-dense MXU matmul covers all T steps.
    gates_x0 = jnp.dot(x_ref[...], wih0_ref[...],
                       preferred_element_type=jnp.float32)            # (T*Bp, 4H)

    w_big = wbig_ref[...]                                             # resident all steps
    bias = jnp.broadcast_to(bbig_ref[...], (Bp, L * G))               # hoisted broadcast

    h = [jnp.zeros((Bp, H), jnp.float32) for _ in range(L)]
    c = [jnp.zeros((Bp, H), jnp.float32) for _ in range(L)]

    # Wavefront: at wavefront step s, layer l advances its own timestep t = s - l.
    # All active layers share ONE packed matmul on the serial recurrence path.
    for s in range(T + L - 1):
        h_cat = h[0] if L == 1 else jnp.concatenate(h, axis=1)        # (Bp, L*H)
        gates_all = (jnp.dot(h_cat, w_big,
                             preferred_element_type=jnp.float32)
                     + bias)                                          # (Bp, L*4H)
        h_new, c_new = list(h), list(c)
        for l in range(L):
            t = s - l
            if 0 <= t < T:                                            # static condition
                g = gates_all[:, l * G:(l + 1) * G]                   # 128-lane aligned
                if l == 0:
                    g = g + gates_x0[t * Bp:(t + 1) * Bp, :]
                # Two full-width (128-lane) EUP passes; per-gate slices stay in one vreg.
                sg = jax.nn.sigmoid(g)
                tg = jnp.tanh(g)
                i_g = sg[:, 0 * H:1 * H]
                f_g = sg[:, 1 * H:2 * H]
                g_g = tg[:, 2 * H:3 * H]
                o_g = sg[:, 3 * H:4 * H]
                c_new[l] = f_g * c[l] + i_g * g_g
                h_new[l] = o_g * jnp.tanh(c_new[l])
                # Inter-layer dropout (p=0.25) is identity in eval.
        h, c = h_new, c_new

    # fc(h_out.view(-1, H)); output dropout (p=0.2) is identity in eval.
    h_out = h[0] if L == 1 else jnp.concatenate(h, axis=0)            # (L*Bp, H)
    out_ref[...] = (jnp.dot(h_out, wfc_ref[...],
                            preferred_element_type=jnp.float32) + bfc_ref[...])


# ------------------------------ Model wrapper ---------------------------------
def lstm_model_forward(x, lstm_params, w_fc, b_fc, hidden, num_layers):
    """x: (B, T, input_size). Returns (num_layers*B, num_classes), matching
    PyTorch's h_out.view(-1, hidden) -> fc -> dropout(eval=identity)."""
    batch, seq, din = x.shape
    num_classes = w_fc.shape[1]
    H, L = hidden, num_layers

    # Pad batch up to a full 8-sublane tile (zero rows, sliced off below): free on
    # VPU/EUP, removes masked partial ops from the per-step path.
    bp = -(-batch // 8) * 8
    x_tm = jnp.transpose(x, (1, 0, 2))                                # (T, B, Din)
    x_tm = jnp.pad(x_tm, ((0, 0), (0, bp - batch), (0, 0)))
    x_tm = x_tm.reshape(seq * bp, din)

    # Block bi-diagonal recurrent weight + stacked gate biases (built once, in JAX).
    w_big = jnp.zeros((L * H, L * 4 * H), jnp.float32)
    b_big = jnp.zeros((1, L * 4 * H), jnp.float32)
    for l, (wih, whh, b) in enumerate(lstm_params):
        w_big = w_big.at[l * H:(l + 1) * H, l * 4 * H:(l + 1) * 4 * H].set(whh)
        if l >= 1:
            w_big = w_big.at[(l - 1) * H:l * H, l * 4 * H:(l + 1) * 4 * H].set(wih)
        b_big = b_big.at[:, l * 4 * H:(l + 1) * 4 * H].set(b)
    wih0 = lstm_params[0][0]

    kernel = functools.partial(_lstm_model_kernel, seq=seq, batch_p=bp,
                               hidden=H, num_layers=L)
    vmem = pl.BlockSpec(memory_space=pltpu.MemorySpace.VMEM)
    out_p = pl.pallas_call(
        kernel,
        out_shape=jax.ShapeDtypeStruct((L * bp, num_classes), jnp.float32),
        in_specs=[vmem] * 6,
        out_specs=vmem,
    )(x_tm, wih0, w_big, b_big, w_fc, b_fc)

    # Drop padded batch rows: (L*Bp, C) -> (L*B, C) in layer-major order,
    # matching PyTorch h_out.view(-1, hidden) -> fc.
    return out_p.reshape(L, bp, num_classes)[:, :batch, :].reshape(
        L * batch, num_classes)


# ------------------------------ Pure-JAX reference ----------------------------
def lstm_model_ref(x, lstm_params, w_fc, b_fc, hidden, num_layers):
    B = x.shape[0]
    layer_in = jnp.transpose(x, (1, 0, 2))
    h_lasts = []
    for l in range(num_layers):
        wih, whh, b = lstm_params[l]

        def step(carry, x_t):
            h, c = carry
            gates = x_t @ wih + h @ whh + b[0]
            i = jax.nn.sigmoid(gates[:, :hidden])
            f = jax.nn.sigmoid(gates[:, hidden:2 * hidden])
            g = jnp.tanh(gates[:, 2 * hidden:3 * hidden])
            o = jax.nn.sigmoid(gates[:, 3 * hidden:])
            c = f * c + i * g
            h = o * jnp.tanh(c)
            return (h, c), h

        h0 = jnp.zeros((B, hidden), jnp.float32)
        c0 = jnp.zeros((B, hidden), jnp.float32)
        (h, _), ys = jax.lax.scan(step, (h0, c0), layer_in)
        layer_in = ys
        h_lasts.append(h)
    h_out = jnp.stack(h_lasts, axis=0).reshape(-1, hidden)
    return h_out @ w_fc + b_fc


# ----------------------------------- Main --------------------------------------
if __name__ == "__main__":
    # Small shapes consistent with the module's forward.
    batch, seq = 2, 8
    input_size, hidden_size, num_classes, num_layers = 4, 32, 5, 2

    key = jax.random.PRNGKey(0)
    k_x, k_p = jax.random.split(key)
    x = jax.random.normal(k_x, (batch, seq, input_size), dtype=jnp.float32)

    # Deterministic parameter init (PyTorch-style U(-1/sqrt(H), 1/sqrt(H))).
    bound = 1.0 / jnp.sqrt(jnp.float32(hidden_size))
    lstm_params = []
    keys = jax.random.split(k_p, num_layers * 4 + 2)
    for l in range(num_layers):
        din = input_size if l == 0 else hidden_size
        kw_ih, kw_hh, kb_ih, kb_hh = keys[4 * l:4 * l + 4]
        # Stored transposed relative to PyTorch: (Din, 4H) / (H, 4H), gate order i,f,g,o.
        wih = jax.random.uniform(kw_ih, (din, 4 * hidden_size), jnp.float32, -bound, bound)
        whh = jax.random.uniform(kw_hh, (hidden_size, 4 * hidden_size), jnp.float32, -bound, bound)
        b_ih = jax.random.uniform(kb_ih, (1, 4 * hidden_size), jnp.float32, -bound, bound)
        b_hh = jax.random.uniform(kb_hh, (1, 4 * hidden_size), jnp.float32, -bound, bound)
        lstm_params.append((wih, whh, b_ih + b_hh))
    w_fc = jax.random.uniform(keys[-2], (hidden_size, num_classes), jnp.float32, -bound, bound)
    b_fc = jax.random.uniform(keys[-1], (1, num_classes), jnp.float32, -bound, bound)

    out = lstm_model_forward(x, lstm_params, w_fc, b_fc, hidden_size, num_layers)
    out = jax.block_until_ready(out)

    ref = lstm_model_ref(x, lstm_params, w_fc, b_fc, hidden_size, num_layers)
    assert out.shape == (num_layers * batch, num_classes), out.shape
    assert jnp.allclose(out, ref, atol=1e-5, rtol=1e-5), "mismatch vs reference"

    print("KERNEL_OK")
</pallas_src>

<mosaic_0001>
module attributes {stable_mosaic.version = 11 : i64} {
  func.func @_lstm_model_kernel(%arg0: memref<64x4xf32, #tpu.memory_space<vmem>>, %arg1: memref<4x128xf32, #tpu.memory_space<vmem>>, %arg2: memref<64x256xf32, #tpu.memory_space<vmem>>, %arg3: memref<1x256xf32, #tpu.memory_space<vmem>>, %arg4: memref<32x5xf32, #tpu.memory_space<vmem>>, %arg5: memref<1x5xf32, #tpu.memory_space<vmem>>, %arg6: memref<16x5xf32, #tpu.memory_space<vmem>>) attributes {dimension_semantics = [], scalar_prefetch = 0 : i64, scratch_operands = 0 : i64, tpu.core_type = #tpu.core_type<tc>} {
    %c0 = arith.constant 0 : index
    %c0_0 = arith.constant 0 : index
    %0 = vector.load %arg0[%c0, %c0_0] : memref<64x4xf32, #tpu.memory_space<vmem>>, vector<64x4xf32>
    %c0_1 = arith.constant 0 : index
    %c0_2 = arith.constant 0 : index
    %1 = vector.load %arg1[%c0_1, %c0_2] : memref<4x128xf32, #tpu.memory_space<vmem>>, vector<4x128xf32>
    %cst = arith.constant dense<0.000000e+00> : vector<64x128xf32>
    %2 = tpu.matmul %0, %1, %cst {dimension_numbers = #tpu.dot_dimension_numbers<[1], [0], [0], [1], [0, 0, 1, 1], [], []>} : vector<64x4xf32>, vector<4x128xf32>, vector<64x128xf32> -> vector<64x128xf32>
    %c0_3 = arith.constant 0 : index
    %c0_4 = arith.constant 0 : index
    %3 = vector.load %arg2[%c0_3, %c0_4] : memref<64x256xf32, #tpu.memory_space<vmem>>, vector<64x256xf32>
    %c0_5 = arith.constant 0 : index
    %c0_6 = arith.constant 0 : index
    %4 = vector.load %arg3[%c0_5, %c0_6] : memref<1x256xf32, #tpu.memory_space<vmem>>, vector<1x256xf32>
    %5 = vector.shape_cast %4 : vector<1x256xf32> to vector<1x256xf32>
    %6 = vector.broadcast %5 : vector<1x256xf32> to vector<8x256xf32>
    %cst_7 = arith.constant 0.000000e+00 : f32
    %7 = vector.broadcast %cst_7 : f32 to vector<8x32xf32>
    %cst_8 = arith.constant 0.000000e+00 : f32
    %8 = vector.broadcast %cst_8 : f32 to vector<8x32xf32>
    %cst_9 = arith.constant 0.000000e+00 : f32
    %9 = vector.broadcast %cst_9 : f32 to vector<8x32xf32>
    %cst_10 = arith.constant 0.000000e+00 : f32
    %10 = vector.broadcast %cst_10 : f32 to vector<8x32xf32>
    %11 = tpu.concatenate %7, %8 in 1 : vector<8x32xf32>, vector<8x32xf32> -> vector<8x64xf32>
    %cst_11 = arith.constant dense<0.000000e+00> : vector<8x256xf32>
    %12 = tpu.matmul %11, %3, %cst_11 {dimension_numbers = #tpu.dot_dimension_numbers<[1], [0], [0], [1], [0, 0, 1, 1], [], []>} : vector<8x64xf32>, vector<64x256xf32>, vector<8x256xf32> -> vector<8x256xf32>
    %13 = arith.addf %12, %6 : vector<8x256xf32>
    %14 = vector.extract_strided_slice %13 {offsets = [0, 0], sizes = [8, 128], strides = [1, 1]} : vector<8x256xf32> to vector<8x128xf32>
    %15 = vector.extract_strided_slice %2 {offsets = [0, 0], sizes = [8, 128], strides = [1, 1]} : vector<64x128xf32> to vector<8x128xf32>
    %16 = arith.addf %14, %15 : vector<8x128xf32>
    %17 = arith.negf %16 : vector<8x128xf32>
    %18 = math.exp %17 : vector<8x128xf32>
    %cst_12 = arith.constant 1.000000e+00 : f32
    %19 = vector.broadcast %cst_12 : f32 to vector<8x128xf32>
    %20 = arith.addf %19, %18 : vector<8x128xf32>
    %21 = arith.divf %19, %20 : vector<8x128xf32>
    %22 = math.tanh %16 : vector<8x128xf32>
    %23 = vector.extract_strided_slice %21 {offsets = [0, 0], sizes = [8, 32], strides = [1, 1]} : vector<8x128xf32> to vector<8x32xf32>
    %24 = vector.extract_strided_slice %21 {offsets = [0, 32], sizes = [8, 32], strides = [1, 1]} : vector<8x128xf32> to vector<8x32xf32>
    %25 = vector.extract_strided_slice %22 {offsets = [0, 64], sizes = [8, 32], strides = [1, 1]} : vector<8x128xf32> to vector<8x32xf32>
    %26 = vector.extract_strided_slice %21 {offsets = [0, 96], sizes = [8, 32], strides = [1, 1]} : vector<8x128xf32> to vector<8x32xf32>
    %27 = arith.mulf %24, %9 : vector<8x32xf32>
    %28 = arith.mulf %23, %25 : vector<8x32xf32>
    %29 = arith.addf %27, %28 : vector<8x32xf32>
    %30 = math.tanh %29 : vector<8x32xf32>
    %31 = arith.mulf %26, %30 : vector<8x32xf32>
    %32 = tpu.concatenate %31, %8 in 1 : vector<8x32xf32>, vector<8x32xf32> -> vector<8x64xf32>
    %cst_13 = arith.constant dense<0.000000e+00> : vector<8x256xf32>
    %33 = tpu.matmul %32, %3, %cst_13 {dimension_numbers = #tpu.dot_dimension_numbers<[1], [0], [0], [1], [0, 0, 1, 1], [], []>} : vector<8x64xf32>, vector<64x256xf32>, vector<8x256xf32> -> vector<8x256xf32>
    %34 = arith.addf %33, %6 : vector<8x256xf32>
    %35 = vector.extract_strided_slice %34 {offsets = [0, 0], sizes = [8, 128], strides = [1, 1]} : vector<8x256xf32> to vector<8x128xf32>
    %36 = vector.extract_strided_slice %2 {offsets = [8, 0], sizes = [8, 128], strides = [1, 1]} : vector<64x128xf32> to vector<8x128xf32>
    %37 = arith.addf %35, %36 : vector<8x128xf32>
    %38 = arith.negf %37 : vector<8x128xf32>
    %39 = math.exp %38 : vector<8x128xf32>
    %cst_14 = arith.constant 1.000000e+00 : f32
    %40 = vector.broadcast %cst_14 : f32 to vector<8x128xf32>
    %41 = arith.addf %40, %39 : vector<8x128xf32>
    %42 = arith.divf %40, %41 : vector<8x128xf32>
    %43 = math.tanh %37 : vector<8x128xf32>
    %44 = vector.extract_strided_slice %42 {offsets = [0, 0], sizes = [8, 32], strides = [1, 1]} : vector<8x128xf32> to vector<8x32xf32>
    %45 = vector.extract_strided_slice %42 {offsets = [0, 32], sizes = [8, 32], strides = [1, 1]} : vector<8x128xf32> to vector<8x32xf32>
    %46 = vector.extract_strided_slice %43 {offsets = [0, 64], sizes = [8, 32], strides = [1, 1]} : vector<8x128xf32> to vector<8x32xf32>
    %47 = vector.extract_strided_slice %42 {offsets = [0, 96], sizes = [8, 32], strides = [1, 1]} : vector<8x128xf32> to vector<8x32xf32>
    %48 = arith.mulf %45, %29 : vector<8x32xf32>
    %49 = arith.mulf %44, %46 : vector<8x32xf32>
    %50 = arith.addf %48, %49 : vector<8x32xf32>
    %51 = math.tanh %50 : vector<8x32xf32>
    %52 = arith.mulf %47, %51 : vector<8x32xf32>
    %53 = vector.extract_strided_slice %34 {offsets = [0, 128], sizes = [8, 128], strides = [1, 1]} : vector<8x256xf32> to vector<8x128xf32>
    %54 = arith.negf %53 : vector<8x128xf32>
    %55 = math.exp %54 : vector<8x128xf32>
    %cst_15 = arith.constant 1.000000e+00 : f32
    %56 = vector.broadcast %cst_15 : f32 to vector<8x128xf32>
    %57 = arith.addf %56, %55 : vector<8x128xf32>
    %58 = arith.divf %56, %57 : vector<8x128xf32>
    %59 = math.tanh %53 : vector<8x128xf32>
    %60 = vector.extract_strided_slice %58 {offsets = [0, 0], sizes = [8, 32], strides = [1, 1]} : vector<8x128xf32> to vector<8x32xf32>
    %61 = vector.extract_strided_slice %58 {offsets = [0, 32], sizes = [8, 32], strides = [1, 1]} : vector<8x128xf32> to vector<8x32xf32>
    %62 = vector.extract_strided_slice %59 {offsets = [0, 64], sizes = [8, 32], strides = [1, 1]} : vector<8x128xf32> to vector<8x32xf32>
    %63 = vector.extract_strided_slice %58 {offsets = [0, 96], sizes = [8, 32], strides = [1, 1]} : vector<8x128xf32> to vector<8x32xf32>
    %64 = arith.mulf %61, %10 : vector<8x32xf32>
    %65 = arith.mulf %60, %62 : vector<8x32xf32>
    %66 = arith.addf %64, %65 : vector<8x32xf32>
    %67 = math.tanh %66 : vector<8x32xf32>
    %68 = arith.mulf %63, %67 : vector<8x32xf32>
    %69 = tpu.concatenate %52, %68 in 1 : vector<8x32xf32>, vector<8x32xf32> -> vector<8x64xf32>
    %cst_16 = arith.constant dense<0.000000e+00> : vector<8x256xf32>
    %70 = tpu.matmul %69, %3, %cst_16 {dimension_numbers = #tpu.dot_dimension_numbers<[1], [0], [0], [1], [0, 0, 1, 1], [], []>} : vector<8x64xf32>, vector<64x256xf32>, vector<8x256xf32> -> vector<8x256xf32>
    %71 = arith.addf %70, %6 : vector<8x256xf32>
    %72 = vector.extract_strided_slice %71 {offsets = [0, 0], sizes = [8, 128], strides = [1, 1]} : vector<8x256xf32> to vector<8x128xf32>
    %73 = vector.extract_strided_slice %2 {offsets = [16, 0], sizes = [8, 128], strides = [1, 1]} : vector<64x128xf32> to vector<8x128xf32>
    %74 = arith.addf %72, %73 : vector<8x128xf32>
    %75 = arith.negf %74 : vector<8x128xf32>
    %76 = math.exp %75 : vector<8x128xf32>
    %cst_17 = arith.constant 1.000000e+00 : f32
    %77 = vector.broadcast %cst_17 : f32 to vector<8x128xf32>
    %78 = arith.addf %77, %76 : vector<8x128xf32>
    %79 = arith.divf %77, %78 : vector<8x128xf32>
    %80 = math.tanh %74 : vector<8x128xf32>
    %81 = vector.extract_strided_slice %79 {offsets = [0, 0], sizes = [8, 32], strides = [1, 1]} : vector<8x128xf32> to vector<8x32xf32>
    %82 = vector.extract_strided_slice %79 {offsets = [0, 32], sizes = [8, 32], strides = [1, 1]} : vector<8x128xf32> to vector<8x32xf32>
    %83 = vector.extract_strided_slice %80 {offsets = [0, 64], sizes = [8, 32], strides = [1, 1]} : vector<8x128xf32> to vector<8x32xf32>
    %84 = vector.extract_strided_slice %79 {offsets = [0, 96], sizes = [8, 32], strides = [1, 1]} : vector<8x128xf32> to vector<8x32xf32>
    %85 = arith.mulf %82, %50 : vector<8x32xf32>
    %86 = arith.mulf %81, %83 : vector<8x32xf32>
    %87 = arith.addf %85, %86 : vector<8x32xf32>
    %88 = math.tanh %87 : vector<8x32xf32>
    %89 = arith.mulf %84, %88 : vector<8x32xf32>
    %90 = vector.extract_strided_slice %71 {offsets = [0, 128], sizes = [8, 128], strides = [1, 1]} : vector<8x256xf32> to vector<8x128xf32>
    %91 = arith.negf %90 : vector<8x128xf32>
    %92 = math.exp %91 : vector<8x128xf32>
    %cst_18 = arith.constant 1.000000e+00 : f32
    %93 = vector.broadcast %cst_18 : f32 to vector<8x128xf32>
    %94 = arith.addf %93, %92 : vector<8x128xf32>
    %95 = arith.divf %93, %94 : vector<8x128xf32>
    %96 = math.tanh %90 : vector<8x128xf32>
    %97 = vector.extract_strided_slice %95 {offsets = [0, 0], sizes = [8, 32], strides = [1, 1]} : vector<8x128xf32> to vector<8x32xf32>
    %98 = vector.extract_strided_slice %95 {offsets = [0, 32], sizes = [8, 32], strides = [1, 1]} : vector<8x128xf32> to vector<8x32xf32>
    %99 = vector.extract_strided_slice %96 {offsets = [0, 64], sizes = [8, 32], strides = [1, 1]} : vector<8x128xf32> to vector<8x32xf32>
    %100 = vector.extract_strided_slice %95 {offsets = [0, 96], sizes = [8, 32], strides = [1, 1]} : vector<8x128xf32> to vector<8x32xf32>
    %101 = arith.mulf %98, %66 : vector<8x32xf32>
    %102 = arith.mulf %97, %99 : vector<8x32xf32>
    %103 = arith.addf %101, %102 : vector<8x32xf32>
    %104 = math.tanh %103 : vector<8x32xf32>
    %105 = arith.mulf %100, %104 : vector<8x32xf32>
    %106 = tpu.concatenate %89, %105 in 1 : vector<8x32xf32>, vector<8x32xf32> -> vector<8x64xf32>
    %cst_19 = arith.constant dense<0.000000e+00> : vector<8x256xf32>
    %107 = tpu.matmul %106, %3, %cst_19 {dimension_numbers = #tpu.dot_dimension_numbers<[1], [0], [0], [1], [0, 0, 1, 1], [], []>} : vector<8x64xf32>, vector<64x256xf32>, vector<8x256xf32> -> vector<8x256xf32>
    %108 = arith.addf %107, %6 : vector<8x256xf32>
    %109 = vector.extract_strided_slice %108 {offsets = [0, 0], sizes = [8, 128], strides = [1, 1]} : vector<8x256xf32> to vector<8x128xf32>
    %110 = vector.extract_strided_slice %2 {offsets = [24, 0], sizes = [8, 128], strides = [1, 1]} : vector<64x128xf32> to vector<8x128xf32>
    %111 = arith.addf %109, %110 : vector<8x128xf32>
    %112 = arith.negf %111 : vector<8x128xf32>
    %113 = math.exp %112 : vector<8x128xf32>
    %cst_20 = arith.constant 1.000000e+00 : f32
    %114 = vector.broadcast %cst_20 : f32 to vector<8x128xf32>
    %115 = arith.addf %114, %113 : vector<8x128xf32>
    %116 = arith.divf %114, %115 : vector<8x128xf32>
    %117 = math.tanh %111 : vector<8x128xf32>
    %118 = vector.extract_strided_slice %116 {offsets = [0, 0], sizes = [8, 32], strides = [1, 1]} : vector<8x128xf32> to vector<8x32xf32>
    %119 = vector.extract_strided_slice %116 {offsets = [0, 32], sizes = [8, 32], strides = [1, 1]} : vector<8x128xf32> to vector<8x32xf32>
    %120 = vector.extract_strided_slice %117 {offsets = [0, 64], sizes = [8, 32], strides = [1, 1]} : vector<8x128xf32> to vector<8x32xf32>
    %121 = vector.extract_strided_slice %116 {offsets = [0, 96], sizes = [8, 32], strides = [1, 1]} : vector<8x128xf32> to vector<8x32xf32>
    %122 = arith.mulf %119, %87 : vector<8x32xf32>
    %123 = arith.mulf %118, %120 : vector<8x32xf32>
    %124 = arith.addf %122, %123 : vector<8x32xf32>
    %125 = math.tanh %124 : vector<8x32xf32>
    %126 = arith.mulf %121, %125 : vector<8x32xf32>
    %127 = vector.extract_strided_slice %108 {offsets = [0, 128], sizes = [8, 128], strides = [1, 1]} : vector<8x256xf32> to vector<8x128xf32>
    %128 = arith.negf %127 : vector<8x128xf32>
    %129 = math.exp %128 : vector<8x128xf32>
    %cst_21 = arith.constant 1.000000e+00 : f32
    %130 = vector.broadcast %cst_21 : f32 to vector<8x128xf32>
    %131 = arith.addf %130, %129 : vector<8x128xf32>
    %132 = arith.divf %130, %131 : vector<8x128xf32>
    %133 = math.tanh %127 : vector<8x128xf32>
    %134 = vector.extract_strided_slice %132 {offsets = [0, 0], sizes = [8, 32], strides = [1, 1]} : vector<8x128xf32> to vector<8x32xf32>
    %135 = vector.extract_strided_slice %132 {offsets = [0, 32], sizes = [8, 32], strides = [1, 1]} : vector<8x128xf32> to vector<8x32xf32>
    %136 = vector.extract_strided_slice %133 {offsets = [0, 64], sizes = [8, 32], strides = [1, 1]} : vector<8x128xf32> to vector<8x32xf32>
    %137 = vector.extract_strided_slice %132 {offsets = [0, 96], sizes = [8, 32], strides = [1, 1]} : vector<8x128xf32> to vector<8x32xf32>
    %138 = arith.mulf %135, %103 : vector<8x32xf32>
    %139 = arith.mulf %134, %136 : vector<8x32xf32>
    %140 = arith.addf %138, %139 : vector<8x32xf32>
    %141 = math.tanh %140 : vector<8x32xf32>
    %142 = arith.mulf %137, %141 : vector<8x32xf32>
    %143 = tpu.concatenate %126, %142 in 1 : vector<8x32xf32>, vector<8x32xf32> -> vector<8x64xf32>
    %cst_22 = arith.constant dense<0.000000e+00> : vector<8x256xf32>
    %144 = tpu.matmul %143, %3, %cst_22 {dimension_numbers = #tpu.dot_dimension_numbers<[1], [0], [0], [1], [0, 0, 1, 1], [], []>} : vector<8x64xf32>, vector<64x256xf32>, vector<8x256xf32> -> vector<8x256xf32>
    %145 = arith.addf %144, %6 : vector<8x256xf32>
    %146 = vector.extract_strided_slice %145 {offsets = [0, 0], sizes = [8, 128], strides = [1, 1]} : vector<8x256xf32> to vector<8x128xf32>
    %147 = vector.extract_strided_slice %2 {offsets = [32, 0], sizes = [8, 128], strides = [1, 1]} : vector<64x128xf32> to vector<8x128xf32>
    %148 = arith.addf %146, %147 : vector<8x128xf32>
    %149 = arith.negf %148 : vector<8x128xf32>
    %150 = math.exp %149 : vector<8x128xf32>
    %cst_23 = arith.constant 1.000000e+00 : f32
    %151 = vector.broadcast %cst_23 : f32 to vector<8x128xf32>
    %152 = arith.addf %151, %150 : vector<8x128xf32>
    %153 = arith.divf %151, %152 : vector<8x128xf32>
    %154 = math.tanh %148 : vector<8x128xf32>
    %155 = vector.extract_strided_slice %153 {offsets = [0, 0], sizes = [8, 32], strides = [1, 1]} : vector<8x128xf32> to vector<8x32xf32>
    %156 = vector.extract_strided_slice %153 {offsets = [0, 32], sizes = [8, 32], strides = [1, 1]} : vector<8x128xf32> to vector<8x32xf32>
    %157 = vector.extract_strided_slice %154 {offsets = [0, 64], sizes = [8, 32], strides = [1, 1]} : vector<8x128xf32> to vector<8x32xf32>
    %158 = vector.extract_strided_slice %153 {offsets = [0, 96], sizes = [8, 32], strides = [1, 1]} : vector<8x128xf32> to vector<8x32xf32>
    %159 = arith.mulf %156, %124 : vector<8x32xf32>
    %160 = arith.mulf %155, %157 : vector<8x32xf32>
    %161 = arith.addf %159, %160 : vector<8x32xf32>
    %162 = math.tanh %161 : vector<8x32xf32>
    %163 = arith.mulf %158, %162 : vector<8x32xf32>
    %164 = vector.extract_strided_slice %145 {offsets = [0, 128], sizes = [8, 128], strides = [1, 1]} : vector<8x256xf32> to vector<8x128xf32>
    %165 = arith.negf %164 : vector<8x128xf32>
    %166 = math.exp %165 : vector<8x128xf32>
    %cst_24 = arith.constant 1.000000e+00 : f32
    %167 = vector.broadcast %cst_24 : f32 to vector<8x128xf32>
    %168 = arith.addf %167, %166 : vector<8x128xf32>
    %169 = arith.divf %167, %168 : vector<8x128xf32>
    %170 = math.tanh %164 : vector<8x128xf32>
    %171 = vector.extract_strided_slice %169 {offsets = [0, 0], sizes = [8, 32], strides = [1, 1]} : vector<8x128xf32> to vector<8x32xf32>
    %172 = vector.extract_strided_slice %169 {offsets = [0, 32], sizes = [8, 32], strides = [1, 1]} : vector<8x128xf32> to vector<8x32xf32>
    %173 = vector.extract_strided_slice %170 {offsets = [0, 64], sizes = [8, 32], strides = [1, 1]} : vector<8x128xf32> to vector<8x32xf32>
    %174 = vector.extract_strided_slice %169 {offsets = [0, 96], sizes = [8, 32], strides = [1, 1]} : vector<8x128xf32> to vector<8x32xf32>
    %175 = arith.mulf %172, %140 : vector<8x32xf32>
    %176 = arith.mulf %171, %173 : vector<8x32xf32>
    %177 = arith.addf %175, %176 : vector<8x32xf32>
    %178 = math.tanh %177 : vector<8x32xf32>
    %179 = arith.mulf %174, %178 : vector<8x32xf32>
    %180 = tpu.concatenate %163, %179 in 1 : vector<8x32xf32>, vector<8x32xf32> -> vector<8x64xf32>
    %cst_25 = arith.constant dense<0.000000e+00> : vector<8x256xf32>
    %181 = tpu.matmul %180, %3, %cst_25 {dimension_numbers = #tpu.dot_dimension_numbers<[1], [0], [0], [1], [0, 0, 1, 1], [], []>} : vector<8x64xf32>, vector<64x256xf32>, vector<8x256xf32> -> vector<8x256xf32>
    %182 = arith.addf %181, %6 : vector<8x256xf32>
    %183 = vector.extract_strided_slice %182 {offsets = [0, 0], sizes = [8, 128], strides = [1, 1]} : vector<8x256xf32> to vector<8x128xf32>
    %184 = vector.extract_strided_slice %2 {offsets = [40, 0], sizes = [8, 128], strides = [1, 1]} : vector<64x128xf32> to vector<8x128xf32>
    %185 = arith.addf %183, %184 : vector<8x128xf32>
    %186 = arith.negf %185 : vector<8x128xf32>
    %187 = math.exp %186 : vector<8x128xf32>
    %cst_26 = arith.constant 1.000000e+00 : f32
    %188 = vector.broadcast %cst_26 : f32 to vector<8x128xf32>
    %189 = arith.addf %188, %187 : vector<8x128xf32>
    %190 = arith.divf %188, %189 : vector<8x128xf32>
    %191 = math.tanh %185 : vector<8x128xf32>
    %192 = vector.extract_strided_slice %190 {offsets = [0, 0], sizes = [8, 32], strides = [1, 1]} : vector<8x128xf32> to vector<8x32xf32>
    %193 = vector.extract_strided_slice %190 {offsets = [0, 32], sizes = [8, 32], strides = [1, 1]} : vector<8x128xf32> to vector<8x32xf32>
    %194 = vector.extract_strided_slice %191 {offsets = [0, 64], sizes = [8, 32], strides = [1, 1]} : vector<8x128xf32> to vector<8x32xf32>
    %195 = vector.extract_strided_slice %190 {offsets = [0, 96], sizes = [8, 32], strides = [1, 1]} : vector<8x128xf32> to vector<8x32xf32>
    %196 = arith.mulf %193, %161 : vector<8x32xf32>
    %197 = arith.mulf %192, %194 : vector<8x32xf32>
    %198 = arith.addf %196, %197 : vector<8x32xf32>
    %199 = math.tanh %198 : vector<8x32xf32>
    %200 = arith.mulf %195, %199 : vector<8x32xf32>
    %201 = vector.extract_strided_slice %182 {offsets = [0, 128], sizes = [8, 128], strides = [1, 1]} : vector<8x256xf32> to vector<8x128xf32>
    %202 = arith.negf %201 : vector<8x128xf32>
    %203 = math.exp %202 : vector<8x128xf32>
    %cst_27 = arith.constant 1.000000e+00 : f32
    %204 = vector.broadcast %cst_27 : f32 to vector<8x128xf32>
    %205 = arith.addf %204, %203 : vector<8x128xf32>
    %206 = arith.divf %204, %205 : vector<8x128xf32>
    %207 = math.tanh %201 : vector<8x128xf32>
    %208 = vector.extract_strided_slice %206 {offsets = [0, 0], sizes = [8, 32], strides = [1, 1]} : vector<8x128xf32> to vector<8x32xf32>
    %209 = vector.extract_strided_slice %206 {offsets = [0, 32], sizes = [8, 32], strides = [1, 1]} : vector<8x128xf32> to vector<8x32xf32>
    %210 = vector.extract_strided_slice %207 {offsets = [0, 64], sizes = [8, 32], strides = [1, 1]} : vector<8x128xf32> to vector<8x32xf32>
    %211 = vector.extract_strided_slice %206 {offsets = [0, 96], sizes = [8, 32], strides = [1, 1]} : vector<8x128xf32> to vector<8x32xf32>
    %212 = arith.mulf %209, %177 : vector<8x32xf32>
    %213 = arith.mulf %208, %210 : vector<8x32xf32>
    %214 = arith.addf %212, %213 : vector<8x32xf32>
    %215 = math.tanh %214 : vector<8x32xf32>
    %216 = arith.mulf %211, %215 : vector<8x32xf32>
    %217 = tpu.concatenate %200, %216 in 1 : vector<8x32xf32>, vector<8x32xf32> -> vector<8x64xf32>
    %cst_28 = arith.constant dense<0.000000e+00> : vector<8x256xf32>
    %218 = tpu.matmul %217, %3, %cst_28 {dimension_numbers = #tpu.dot_dimension_numbers<[1], [0], [0], [1], [0, 0, 1, 1], [], []>} : vector<8x64xf32>, vector<64x256xf32>, vector<8x256xf32> -> vector<8x256xf32>
    %219 = arith.addf %218, %6 : vector<8x256xf32>
    %220 = vector.extract_strided_slice %219 {offsets = [0, 0], sizes = [8, 128], strides = [1, 1]} : vector<8x256xf32> to vector<8x128xf32>
    %221 = vector.extract_strided_slice %2 {offsets = [48, 0], sizes = [8, 128], strides = [1, 1]} : vector<64x128xf32> to vector<8x128xf32>
    %222 = arith.addf %220, %221 : vector<8x128xf32>
    %223 = arith.negf %222 : vector<8x128xf32>
    %224 = math.exp %223 : vector<8x128xf32>
    %cst_29 = arith.constant 1.000000e+00 : f32
    %225 = vector.broadcast %cst_29 : f32 to vector<8x128xf32>
    %226 = arith.addf %225, %224 : vector<8x128xf32>
    %227 = arith.divf %225, %226 : vector<8x128xf32>
    %228 = math.tanh %222 : vector<8x128xf32>
    %229 = vector.extract_strided_slice %227 {offsets = [0, 0], sizes = [8, 32], strides = [1, 1]} : vector<8x128xf32> to vector<8x32xf32>
    %230 = vector.extract_strided_slice %227 {offsets = [0, 32], sizes = [8, 32], strides = [1, 1]} : vector<8x128xf32> to vector<8x32xf32>
    %231 = vector.extract_strided_slice %228 {offsets = [0, 64], sizes = [8, 32], strides = [1, 1]} : vector<8x128xf32> to vector<8x32xf32>
    %232 = vector.extract_strided_slice %227 {offsets = [0, 96], sizes = [8, 32], strides = [1, 1]} : vector<8x128xf32> to vector<8x32xf32>
    %233 = arith.mulf %230, %198 : vector<8x32xf32>
    %234 = arith.mulf %229, %231 : vector<8x32xf32>
    %235 = arith.addf %233, %234 : vector<8x32xf32>
    %236 = math.tanh %235 : vector<8x32xf32>
    %237 = arith.mulf %232, %236 : vector<8x32xf32>
    %238 = vector.extract_strided_slice %219 {offsets = [0, 128], sizes = [8, 128], strides = [1, 1]} : vector<8x256xf32> to vector<8x128xf32>
    %239 = arith.negf %238 : vector<8x128xf32>
    %240 = math.exp %239 : vector<8x128xf32>
    %cst_30 = arith.constant 1.000000e+00 : f32
    %241 = vector.broadcast %cst_30 : f32 to vector<8x128xf32>
    %242 = arith.addf %241, %240 : vector<8x128xf32>
    %243 = arith.divf %241, %242 : vector<8x128xf32>
    %244 = math.tanh %238 : vector<8x128xf32>
    %245 = vector.extract_strided_slice %243 {offsets = [0, 0], sizes = [8, 32], strides = [1, 1]} : vector<8x128xf32> to vector<8x32xf32>
    %246 = vector.extract_strided_slice %243 {offsets = [0, 32], sizes = [8, 32], strides = [1, 1]} : vector<8x128xf32> to vector<8x32xf32>
    %247 = vector.extract_strided_slice %244 {offsets = [0, 64], sizes = [8, 32], strides = [1, 1]} : vector<8x128xf32> to vector<8x32xf32>
    %248 = vector.extract_strided_slice %243 {offsets = [0, 96], sizes = [8, 32], strides = [1, 1]} : vector<8x128xf32> to vector<8x32xf32>
    %249 = arith.mulf %246, %214 : vector<8x32xf32>
    %250 = arith.mulf %245, %247 : vector<8x32xf32>
    %251 = arith.addf %249, %250 : vector<8x32xf32>
    %252 = math.tanh %251 : vector<8x32xf32>
    %253 = arith.mulf %248, %252 : vector<8x32xf32>
    %254 = tpu.concatenate %237, %253 in 1 : vector<8x32xf32>, vector<8x32xf32> -> vector<8x64xf32>
    %cst_31 = arith.constant dense<0.000000e+00> : vector<8x256xf32>
    %255 = tpu.matmul %254, %3, %cst_31 {dimension_numbers = #tpu.dot_dimension_numbers<[1], [0], [0], [1], [0, 0, 1, 1], [], []>} : vector<8x64xf32>, vector<64x256xf32>, vector<8x256xf32> -> vector<8x256xf32>
    %256 = arith.addf %255, %6 : vector<8x256xf32>
    %257 = vector.extract_strided_slice %256 {offsets = [0, 0], sizes = [8, 128], strides = [1, 1]} : vector<8x256xf32> to vector<8x128xf32>
    %258 = vector.extract_strided_slice %2 {offsets = [56, 0], sizes = [8, 128], strides = [1, 1]} : vector<64x128xf32> to vector<8x128xf32>
    %259 = arith.addf %257, %258 : vector<8x128xf32>
    %260 = arith.negf %259 : vector<8x128xf32>
    %261 = math.exp %260 : vector<8x128xf32>
    %cst_32 = arith.constant 1.000000e+00 : f32
    %262 = vector.broadcast %cst_32 : f32 to vector<8x128xf32>
    %263 = arith.addf %262, %261 : vector<8x128xf32>
    %264 = arith.divf %262, %263 : vector<8x128xf32>
    %265 = math.tanh %259 : vector<8x128xf32>
    %266 = vector.extract_strided_slice %264 {offsets = [0, 0], sizes = [8, 32], strides = [1, 1]} : vector<8x128xf32> to vector<8x32xf32>
    %267 = vector.extract_strided_slice %264 {offsets = [0, 32], sizes = [8, 32], strides = [1, 1]} : vector<8x128xf32> to vector<8x32xf32>
    %268 = vector.extract_strided_slice %265 {offsets = [0, 64], sizes = [8, 32], strides = [1, 1]} : vector<8x128xf32> to vector<8x32xf32>
    %269 = vector.extract_strided_slice %264 {offsets = [0, 96], sizes = [8, 32], strides = [1, 1]} : vector<8x128xf32> to vector<8x32xf32>
    %270 = arith.mulf %267, %235 : vector<8x32xf32>
    %271 = arith.mulf %266, %268 : vector<8x32xf32>
    %272 = arith.addf %270, %271 : vector<8x32xf32>
    %273 = math.tanh %272 : vector<8x32xf32>
    %274 = arith.mulf %269, %273 : vector<8x32xf32>
    %275 = vector.extract_strided_slice %256 {offsets = [0, 128], sizes = [8, 128], strides = [1, 1]} : vector<8x256xf32> to vector<8x128xf32>
    %276 = arith.negf %275 : vector<8x128xf32>
    %277 = math.exp %276 : vector<8x128xf32>
    %cst_33 = arith.constant 1.000000e+00 : f32
    %278 = vector.broadcast %cst_33 : f32 to vector<8x128xf32>
    %279 = arith.addf %278, %277 : vector<8x128xf32>
    %280 = arith.divf %278, %279 : vector<8x128xf32>
    %281 = math.tanh %275 : vector<8x128xf32>
    %282 = vector.extract_strided_slice %280 {offsets = [0, 0], sizes = [8, 32], strides = [1, 1]} : vector<8x128xf32> to vector<8x32xf32>
    %283 = vector.extract_strided_slice %280 {offsets = [0, 32], sizes = [8, 32], strides = [1, 1]} : vector<8x128xf32> to vector<8x32xf32>
    %284 = vector.extract_strided_slice %281 {offsets = [0, 64], sizes = [8, 32], strides = [1, 1]} : vector<8x128xf32> to vector<8x32xf32>
    %285 = vector.extract_strided_slice %280 {offsets = [0, 96], sizes = [8, 32], strides = [1, 1]} : vector<8x128xf32> to vector<8x32xf32>
    %286 = arith.mulf %283, %251 : vector<8x32xf32>
    %287 = arith.mulf %282, %284 : vector<8x32xf32>
    %288 = arith.addf %286, %287 : vector<8x32xf32>
    %289 = math.tanh %288 : vector<8x32xf32>
    %290 = arith.mulf %285, %289 : vector<8x32xf32>
    %291 = tpu.concatenate %274, %290 in 1 : vector<8x32xf32>, vector<8x32xf32> -> vector<8x64xf32>
    %cst_34 = arith.constant dense<0.000000e+00> : vector<8x256xf32>
    %292 = tpu.matmul %291, %3, %cst_34 {dimension_numbers = #tpu.dot_dimension_numbers<[1], [0], [0], [1], [0, 0, 1, 1], [], []>} : vector<8x64xf32>, vector<64x256xf32>, vector<8x256xf32> -> vector<8x256xf32>
    %293 = arith.addf %292, %6 : vector<8x256xf32>
    %294 = vector.extract_strided_slice %293 {offsets = [0, 128], sizes = [8, 128], strides = [1, 1]} : vector<8x256xf32> to vector<8x128xf32>
    %295 = arith.negf %294 : vector<8x128xf32>
    %296 = math.exp %295 : vector<8x128xf32>
    %cst_35 = arith.constant 1.000000e+00 : f32
    %297 = vector.broadcast %cst_35 : f32 to vector<8x128xf32>
    %298 = arith.addf %297, %296 : vector<8x128xf32>
    %299 = arith.divf %297, %298 : vector<8x128xf32>
    %300 = math.tanh %294 : vector<8x128xf32>
    %301 = vector.extract_strided_slice %299 {offsets = [0, 0], sizes = [8, 32], strides = [1, 1]} : vector<8x128xf32> to vector<8x32xf32>
    %302 = vector.extract_strided_slice %299 {offsets = [0, 32], sizes = [8, 32], strides = [1, 1]} : vector<8x128xf32> to vector<8x32xf32>
    %303 = vector.extract_strided_slice %300 {offsets = [0, 64], sizes = [8, 32], strides = [1, 1]} : vector<8x128xf32> to vector<8x32xf32>
    %304 = vector.extract_strided_slice %299 {offsets = [0, 96], sizes = [8, 32], strides = [1, 1]} : vector<8x128xf32> to vector<8x32xf32>
    %305 = arith.mulf %302, %288 : vector<8x32xf32>
    %306 = arith.mulf %301, %303 : vector<8x32xf32>
    %307 = arith.addf %305, %306 : vector<8x32xf32>
    %308 = math.tanh %307 : vector<8x32xf32>
    %309 = arith.mulf %304, %308 : vector<8x32xf32>
    %310 = tpu.concatenate %274, %309 in 0 : vector<8x32xf32>, vector<8x32xf32> -> vector<16x32xf32>
    %c0_36 = arith.constant 0 : index
    %c0_37 = arith.constant 0 : index
    %311 = vector.load %arg4[%c0_36, %c0_37] : memref<32x5xf32, #tpu.memory_space<vmem>>, vector<32x5xf32>
    %cst_38 = arith.constant dense<0.000000e+00> : vector<16x5xf32>
    %312 = tpu.matmul %310, %311, %cst_38 {dimension_numbers = #tpu.dot_dimension_numbers<[1], [0], [0], [1], [0, 0, 1, 1], [], []>} : vector<16x32xf32>, vector<32x5xf32>, vector<16x5xf32> -> vector<16x5xf32>
    %c0_39 = arith.constant 0 : index
    %c0_40 = arith.constant 0 : index
    %313 = vector.load %arg5[%c0_39, %c0_40] : memref<1x5xf32, #tpu.memory_space<vmem>>, vector<1x5xf32>
    %314 = vector.broadcast %313 : vector<1x5xf32> to vector<16x5xf32>
    %315 = arith.addf %312, %314 : vector<16x5xf32>
    %c0_41 = arith.constant 0 : index
    %c0_42 = arith.constant 0 : index
    %316 = vector.load %arg6[%c0_41, %c0_42] : memref<16x5xf32, #tpu.memory_space<vmem>>, vector<16x5xf32>
    tpu.vector_store %arg6[%c0_41, %c0_42], %315 {strides = array<i32>} : memref<16x5xf32, #tpu.memory_space<vmem>>, vector<16x5xf32>,
    return
  }
}

</mosaic_0001>

<bundles_post_ra>
// kernel: tpu_custom_call.1
= control target key start
LH: loop header
LB: loop body
LE: loop exit
PB: predicated region body
PF: predicated region fallthrough
CT: control target
= control target key end

     0   :  { %11 = vsyncpa [#allocation3], 0  ;;  %s1821_s21 = smov [#allocation2]   ;;  %s2166_s0 = inlined_call_operand.vmem [shape: f32[64,4], index: 0, kind: input, shape index: {}]   ;;  %s2167_s1 = inlined_call_operand.vmem [shape: f32[4,128], index: 1, kind: input, shape index: {}]   ;;  %s2168_s2 = inlined_call_operand.hbm [shape: f32[64,256], index: 2, kind: input, shape index: {}]   ;;  %s2169_s3 = inlined_call_operand.vmem [shape: f32[1,256], index: 3, kind: input, shape index: {}]   ;;  %s2170_s4 = inlined_call_operand.vmem [shape: f32[32,5], index: 4, kind: input, shape index: {}]   ;;  %s2171_s5 = inlined_call_operand.vmem [shape: f32[1,5], index: 5, kind: input, shape index: {}]   ;;  %s2172_s6 = inlined_call_operand.vmem [shape: f32[16,5], index: 6, kind: output, shape index: {}]  }
   0x1   :  { %s21_s22 = sshll.u32 %s1821_s21, 4  ;;  %s1797_s25 = scalar_lea.hbm %s2168_s2, 2048  ;;  %s22_s22 = int_to_ptr.vmem [resolvable:$true] %s21_s22 }
   0x2   :  { %p1798_p0 = scmp.ne.s32.totalorder %s2168_s2, %s1797_s25  ;;  %p1801_p1 = scmp.lt.u32.totalorder %s1797_s25, %s2168_s2 }
   0x4   :  { %p1803_p2 = pnand %p1801_p1, %p1798_p0 }
   0x6   :  { %1806 = shalt.err (!%p1803_p2)
}
   0x7   :  { %s1807_s30 = scalar_lea.vmem %s22_s22, 2048  ;;  %p1812_p4 = scmp.lt.s32.totalorder %s22_s22, %s22_s22 }
   0x8   :  { %p1808_p3 = scmp.ne.s32.totalorder %s22_s22, %s1807_s30  ;;  %p1813_p5 = scmp.lt.s32.totalorder %s1807_s30, %s1807_s30 }
   0xa   :  { %p1814_p6 = por %p1813_p5, %p1812_p4 }
   0xc   :  { %p1815_p7 = pnand %p1814_p6, %p1808_p3 }
   0xe   :  { %1818 = shalt.err (!%p1815_p7)
}
   0xf   :  { %s1822_s7 = smov 256   ;;  %s1823_s8 = smov 16  }
  0x10   :  { %27 = dma.hbm_to_vmem [thread:$0]  %s2168_s2, 2048, %s22_s22, [#allocation3], %s1822_s7, %s1822_s7, %s1823_s8  }
  0x11   :  { %1819 = dma.done.wait [#allocation3], 2048  }
  0x12   :  { %1820 = vsyncadd [#allocation3], 4294965248  ;;  %v1824_v0 = vmov 0.0   ;;  %v181_v1 = vld [vmem:[#allocation2 + $0x8] sm:$0xff]  ;;  %v183_v2 = vld [vmem:[#allocation2 + $0x18] sm:$0xff]  ;;  %vm71_vm0 = vcmask 1043456   ;;  %v198_v28 = vlaneseq }
  0x13   :  { %276 = vmatprep.mubr.f32.mxu1 %v1824_v0  ;;  %v180_v3 = vld [vmem:[#allocation2] sm:$0xff]  ;;  %v1875_v4 = vpack.c.bf16 %v183_v2, %v181_v1  ;;  %v182_v5 = vld [vmem:[#allocation2 + $0x10] sm:$0xff]  ;;  %v185_v6 = vld [vmem:[#allocation2 + $0x28] sm:$0xff]  ;;  %vm46_vm1 = vcmask 31744   ;;  %s1825_s17 = smov 64   ;;  %vm311_vm2 = vcmask 261120  }
  0x14   :  { %v187_v7 = vld [vmem:[#allocation2 + $0x38] sm:$0xff]  ;;  %v1877_v8 = vpack.c.bf16 %v182_v5, %v180_v3  ;;  %v184_v10 = vld [vmem:[#allocation2 + $0x20] sm:$0xff]  ;;  %v186_v11 = vld [vmem:[#allocation2 + $0x30] sm:$0xff]  ;;  %v1932_v30 = vshrl.u32 %v198_v28, 7  ;;  %vm208_vm3 = vcmask 523264   ;;  %vm1427_vm4 = vcmask 39936  }
  0x15   :  { %v1879_v9 = vpack.c.bf16 %v187_v7, %v185_v6  ;;  %v189_v12 = vld [vmem:[#allocation2 + $0x48] sm:$0xff]  ;;  %1512 = vmatprep.subr.bf16.mxu1 %v1875_v4  ;;  %v191_v13 = vld [vmem:[#allocation2 + $0x58] sm:$0xff]  ;;  %v1883_v14 = vpack.c.bf16 %v186_v11, %v184_v10  ;;  %v188_v15 = vld [vmem:[#allocation2 + $0x40] sm:$0xff] }
  0x16   :  { %1514 = vmatpush1.bf16.msra.mxu1 %v1877_v8  ;;  %v1886_v16 = vpack.c.bf16 %v191_v13, %v189_v12  ;;  %v190_v17 = vld [vmem:[#allocation2 + $0x50] sm:$0xff]  ;;  %v45_v18 = vld [vmem:[%s2167_s1] sm:$0xf]  ;;  %v193_v20 = vld [vmem:[#allocation2 + $0x68] sm:$0xff]  ;;  %v200_v32 = vsub.s32 0, %v1932_v30  ;;  %v204_v3 = vsub.s32 1, %v1932_v30 }
  0x17   :  { %1516 = vmatprep.subr.bf16.mxu1 %v1879_v9  ;;  %v37_v19 = vld [vmem:[%s2166_s0] sm:$0xff]  ;;  %v195_v21 = vld [vmem:[#allocation2 + $0x78] sm:$0xff]  ;;  %1486 = vmatprep.subr.msk.mxu0 %vm71_vm0, %v45_v18  ;;  %v38_v22 = vld [vmem:[%s2166_s0 + $0x8] sm:$0xff]  ;;  %v1899_v23 = vpack.c.bf16 %v190_v17, %v188_v15 }
  0x18   :  { %1488 = vmatprep.mubr.msk.f32.mxu0 %vm46_vm1, %v37_v19  ;;  %1487 = vmatpush3.msk.msra.mxu0 %vm71_vm0, %v45_v18  ;;  %v1903_v24 = vpack.c.bf16 %v195_v21, %v193_v20  ;;  %v192_v25 = vld [vmem:[#allocation2 + $0x60] sm:$0xff]  ;;  %v194_v26 = vld [vmem:[#allocation2 + $0x70] sm:$0xff]  ;;  %v40_v50 = vld [vmem:[%s2166_s0 + $0x18] sm:$0xff] }
  0x19   :  { %1489 = vmatmul.mubr.msk.f32.vlgmr.msra.gmra.mrb[0].mxu0 %vm46_vm1, %v38_v22  ;;  %1528 = vmatprep.subr.bf16.mxu0 %v1875_v4  ;;  %v1909_v27 = vpack.c.bf16 %v194_v26, %v192_v25  ;;  %v1938_v33 = vld [vmem:[%s2169_s3] sm:$0x3]  ;;  %s1826_s3 = smov 32   ;;  %v39_v49 = vld [vmem:[%s2166_s0 + $0x10] sm:$0xff]  ;;  %v42_v52 = vld [vmem:[%s2166_s0 + $0x28] sm:$0xff] }
  0x1a   :  { %1518 = vmatpush1.bf16.msra.mxu1 %v1883_v14  ;;  %1530 = vmatpush1.bf16.msra.mxu0 %v1877_v8  ;;  %v1941_v34 = vrot.slane %v1938_v33, %v200_v32  ;;  %v41_v51 = vld [vmem:[%s2166_s0 + $0x20] sm:$0xff]  ;;  %v43_v53 = vld [vmem:[%s2166_s0 + $0x30] sm:$0xff]  ;;  %v44_v54 = vld [vmem:[%s2166_s0 + $0x38] sm:$0xff]  ;;  %v2001_v5 = vrot.slane %v1938_v33, %v204_v3 }
  0x1b   :  { %1520 = vmatprep.subr.bf16.mxu1 %v1886_v16  ;;  %1532 = vmatprep.subr.bf16.mxu0 %v1879_v9 }
  0x1c   :  { %1491 = vmatprep.mubr.msk.f32.mxu0 %vm46_vm1, %v39_v49 }
  0x1d   :  { %1492 = vmatmul.mubr.msk.f32.gmra.mrb[2].mxu0 %vm46_vm1, %v40_v50 }
  0x1e   :  { %1522 = vmatpush1.bf16.msra.mxu1 %v1899_v23  ;;  %1534 = vmatpush1.bf16.msra.mxu0 %v1883_v14 }
  0x1f   :  { %1524 = vmatprep.subr.bf16.mxu1 %v1903_v24  ;;  %1536 = vmatprep.subr.bf16.mxu0 %v1886_v16 }
  0x20   :  { %1494 = vmatprep.mubr.msk.f32.mxu0 %vm46_vm1, %v41_v51 }
  0x21   :  { %1495 = vmatmul.mubr.msk.f32.gmra.mrb[4].mxu0 %vm46_vm1, %v42_v52 }
  0x22   :  { %1526 = vmatpush1.bf16.msra.mxu1 %v1909_v27  ;;  %1538 = vmatpush1.bf16.msra.mxu0 %v1899_v23 }
  0x23   :  { %1544 = vmatprep.subr.bf16.mxu1 %v1875_v4  ;;  %1540 = vmatprep.subr.bf16.mxu0 %v1903_v24 }
  0x24   :  { %1497 = vmatprep.mubr.msk.f32.mxu0 %vm46_vm1, %v43_v53 }
  0x25   :  { %277 = vmatmul.mubr.f32.vlgmr.msra.gmra.mrb[0].mxu1 %v1824_v0  ;;  %1498 = vmatmul.mubr.msk.f32.gmra.mrb[6].mxu0 %vm46_vm1, %v44_v54 }
  0x26   :  { %1546 = vmatpush1.bf16.msra.mxu1 %v1877_v8  ;;  %512 = vmatprep.mubr.f32.mxu1 %v1824_v0 }
  0x27   :  { %1548 = vmatprep.subr.bf16.mxu1 %v1879_v9  ;;  %1542 = vmatpush1.bf16.msra.mxu0 %v1909_v27 }
  0x28   :  { %1560 = vmatprep.subr.bf16.mxu0 %v1875_v4  ;;  %380 = vmatprep.mubr.f32.mxu0 %v1824_v0 }
  0x2a   :  { %1550 = vmatpush1.bf16.msra.mxu1 %v1883_v14 }
  0x2b   :  { %1552 = vmatprep.subr.bf16.mxu1 %v1886_v16 }
  0x2e   :  { %1554 = vmatpush1.bf16.msra.mxu1 %v1899_v23 }
  0x2f   :  { %1556 = vmatprep.subr.bf16.mxu1 %v1903_v24 }
  0x32   :  { %1558 = vmatpush1.bf16.msra.mxu1 %v1909_v27 }
  0x33   :  { %1576 = vmatprep.subr.bf16.mxu1 %v1875_v4 }
  0xec   :  { %v1930_v29 = vpop.f32.mrb[0].mxu0 }
  0xed   :  { %v141_v31 = vpop.f32.mrb[1].mxu0 }
  0xf0   :  { %v1976_v58 = vpop.f32.mrb[2].mxu0 }
  0xf1   :  { %v1978_v59 = vpop.f32.mrb[3].mxu0 }
  0xf4   :  { %v1980_v60 = vpop.f32.mrb[4].mxu0 }
  0xf5   :  { %v1982_v61 = vpop.f32.mrb[5].mxu0 }
  0xf8   :  { %v278_v35 = vpop.f32.mrb[0].mxu1  ;;  %v1984_v62 = vpop.f32.mrb[6].mxu0 }
  0xf9   :  { %v279_v36 = vadd.f32 %v278_v35, %v1941_v34  ;;  %v280_v37 = vpop.f32.mrb[1].mxu1  ;;  %v1986_v63 = vpop.f32.mrb[7].mxu0 }
  0xfb   :  { %v282_v38 = vadd.f32 %v279_v36, %v141_v31 }
  0xfd   :  { %1669 = vtanh.f32 %v282_v38  ;;  %v1444_v40 = vmul.f32 -1.442695, %v282_v38 }
  0xff   :  { %1671 = vpow2.f32 %v1444_v40 }
 0x107   :  { %v1670_v39 = vpop.eup %1669 }
 0x108   :  { %292 = vrot.lane.b32.xlu0 %v1670_v39, %s1825_s17 }
 0x109   :  { %v1672_v41 = vpop.eup %1671 }
 0x10a   :  { %v286_v42 = vadd.f32 1.0, %v1672_v41 }
 0x10c   :  { %1673 = vrcp.f32 %v286_v42 }
 0x116   :  { %v1674_v43 = vpop.eup %1673 }
 0x117   :  { %v290_v46 = vmul.f32 0.0, %v1674_v43 }
 0x17a   :  { %v293_v44 = vpop.permute.xlu0 %292 }
 0x17b   :  { %v295_v45 = vmul.f32 %v1674_v43, %v293_v44 }
 0x17d   :  { %297 = vrot.lane.b32.xlu0 %v295_v45, %s1826_s3 }
 0x1ef   :  { %v298_v47 = vpop.permute.xlu0 %297 }
 0x1f0   :  { %v1946_v48 = vadd.f32 %v298_v47, %v290_v46 }
 0x1f2   :  { %1675 = vtanh.f32 %v1946_v48 }
 0x1fc   :  { %v1676_v55 = vpop.eup %1675 }
 0x1fd   :  { %303 = vrot.lane.b32.xlu1 %v1676_v55, %s1825_s17 }
 0x26f   :  { %v304_v56 = vpop.permute.xlu1 %303 }
 0x270   :  { %v306_v57 = vmul.f32 %v1674_v43, %v304_v56 }
 0x272   :  { %308 = vrot.lane.b32.xlu1 %v306_v57, %s1826_s3 }
 0x2e4   :  { %v309_v1 = vpop.permute.xlu1 %308 }
 0x2e5   :  { %v312_v2 = vsel %vm311_vm2, %v309_v1, 0.0 }
 0x2e6   :  { %1445 = vmatmul.mubr.msk.f32.vlgmr.msra.gmra.mrb[8].mxu0 %vm208_vm3, %v312_v2 }
 0x2e7   :  { %1562 = vmatpush1.bf16.msra.mxu0 %v1877_v8  ;;  %644 = vmatprep.mubr.f32.mxu0 %v1824_v0 }
 0x2e8   :  { %1564 = vmatprep.subr.bf16.mxu0 %v1879_v9 }
 0x2eb   :  { %1566 = vmatpush1.bf16.msra.mxu0 %v1883_v14 }
 0x2ec   :  { %1568 = vmatprep.subr.bf16.mxu0 %v1886_v16 }
 0x2ef   :  { %1570 = vmatpush1.bf16.msra.mxu0 %v1899_v23 }
 0x2f0   :  { %1572 = vmatprep.subr.bf16.mxu0 %v1903_v24 }
 0x2f3   :  { %1574 = vmatpush1.bf16.msra.mxu0 %v1909_v27 }
 0x2f4   :  { %1592 = vmatprep.subr.bf16.mxu0 %v1875_v4 }
 0x3b9   :  { %v382_v6 = vpop.f32.mrb[8].mxu0 }
 0x3ba   :  { %v383_v7 = vadd.f32 %v382_v6, %v1941_v34  ;;  %v384_v10 = vpop.f32.mrb[9].mxu0 }
 0x3bb   :  { %v385_v11 = vadd.f32 %v384_v10, %v2001_v5 }
 0x3bc   :  { %v387_v12 = vadd.f32 %v1930_v29, %v383_v7 }
 0x3bd   :  { %1677 = vtanh.f32 %v385_v11  ;;  %v1447_v17 = vmul.f32 -1.442695, %v385_v11 }
 0x3be   :  { %1679 = vtanh.f32 %v387_v12  ;;  %v1446_v18 = vmul.f32 -1.442695, %v387_v12 }
 0x3bf   :  { %1681 = vpow2.f32 %v1447_v17 }
 0x3c0   :  { %1683 = vpow2.f32 %v1446_v18 }
 0x3c7   :  { %v1678_v13 = vpop.eup %1677 }
 0x3c8   :  { %v1680_v15 = vpop.eup %1679  ;;  %421 = vrot.lane.b32.xlu1 %v1678_v13, %s1825_s17 }
 0x3c9   :  { %397 = vrot.lane.b32.xlu0 %v1680_v15, %s1825_s17  ;;  %v1682_v19 = vpop.eup %1681 }
 0x3ca   :  { %v1684_v20 = vpop.eup %1683  ;;  %v415_v21 = vadd.f32 1.0, %v1682_v19 }
 0x3cb   :  { %v391_v22 = vadd.f32 1.0, %v1684_v20 }
 0x3cc   :  { %1685 = vrcp.f32 %v415_v21 }
 0x3cd   :  { %1687 = vrcp.f32 %v391_v22 }
 0x3d6   :  { %v1686_v25 = vpop.eup %1685 }
 0x3d7   :  { %v1688_v28 = vpop.eup %1687  ;;  %v419_v32 = vmul.f32 0.0, %v1686_v25 }
 0x3d8   :  { %v395_v35 = vmul.f32 %v1688_v28, %v1946_v48 }
 0x43a   :  { %v422_v26 = vpop.permute.xlu1 %421 }
 0x43b   :  { %v424_v29 = vmul.f32 %v1686_v25, %v422_v26  ;;  %v398_v30 = vpop.permute.xlu0 %397 }
 0x43c   :  { %v400_v31 = vmul.f32 %v1688_v28, %v398_v30 }
 0x43d   :  { %426 = vrot.lane.b32.xlu1 %v424_v29, %s1826_s3 }
 0x43e   :  { %402 = vrot.lane.b32.xlu0 %v400_v31, %s1826_s3 }
 0x4af   :  { %v427_v33 = vpop.permute.xlu1 %426 }
 0x4b0   :  { %v429_v36 = vadd.f32 %v427_v33, %v419_v32  ;;  %v403_v37 = vpop.permute.xlu0 %402 }
 0x4b1   :  { %v405_v38 = vadd.f32 %v403_v37, %v395_v35 }
 0x4b2   :  { %1689 = vtanh.f32 %v429_v36 }
 0x4b3   :  { %1691 = vtanh.f32 %v405_v38 }
 0x4bc   :  { %v1690_v39 = vpop.eup %1689 }
 0x4bd   :  { %v1692_v40 = vpop.eup %1691  ;;  %432 = vrot.lane.b32.xlu1 %v1690_v39, %s1825_s17 }
 0x4be   :  { %408 = vrot.lane.b32.xlu0 %v1692_v40, %s1825_s17 }
 0x52f   :  { %v433_v41 = vpop.permute.xlu1 %432 }
 0x530   :  { %v435_v42 = vmul.f32 %v1686_v25, %v433_v41  ;;  %v409_v43 = vpop.permute.xlu0 %408 }
 0x531   :  { %v411_v44 = vmul.f32 %v1688_v28, %v409_v43 }
 0x532   :  { %441 = vrot.lane.b32.xlu1 %v435_v42, %s1825_s17 }
 0x533   :  { %437 = vrot.lane.b32.xlu0 %v411_v44, %s1826_s3 }
 0x5a4   :  { %v442_v45 = vpop.permute.xlu1 %441 }
 0x5a5   :  { %v438_v46 = vpop.permute.xlu0 %437 }
 0x5a6   :  { %v444_v47 = vsel %vm311_vm2, %v438_v46, %v442_v45 }
 0x5a7   :  { %1448 = vmatmul.mubr.msk.f32.vlgmr.msra.gmra.mrb[2].mxu1 %vm208_vm3, %v444_v47 }
 0x5a8   :  { %1578 = vmatpush1.bf16.msra.mxu1 %v1877_v8  ;;  %776 = vmatprep.mubr.f32.mxu1 %v1824_v0 }
 0x5a9   :  { %1580 = vmatprep.subr.bf16.mxu1 %v1879_v9 }
 0x5ac   :  { %1582 = vmatpush1.bf16.msra.mxu1 %v1883_v14 }
 0x5ad   :  { %1584 = vmatprep.subr.bf16.mxu1 %v1886_v16 }
 0x5b0   :  { %1586 = vmatpush1.bf16.msra.mxu1 %v1899_v23 }
 0x5b1   :  { %1588 = vmatprep.subr.bf16.mxu1 %v1903_v24 }
 0x5b4   :  { %1590 = vmatpush1.bf16.msra.mxu1 %v1909_v27 }
 0x5b5   :  { %1608 = vmatprep.subr.bf16.mxu1 %v1875_v4 }
 0x67a   :  { %v514_v48 = vpop.f32.mrb[2].mxu1 }
 0x67b   :  { %v515_v49 = vadd.f32 %v514_v48, %v1941_v34  ;;  %v516_v50 = vpop.f32.mrb[3].mxu1 }
 0x67c   :  { %v517_v51 = vadd.f32 %v516_v50, %v2001_v5 }
 0x67d   :  { %v519_v52 = vadd.f32 %v515_v49, %v1978_v59 }
 0x67e   :  { %1693 = vtanh.f32 %v517_v51  ;;  %v1450_v55 = vmul.f32 -1.442695, %v517_v51 }
 0x67f   :  { %1695 = vtanh.f32 %v519_v52  ;;  %v1449_v56 = vmul.f32 -1.442695, %v519_v52 }
 0x680   :  { %1697 = vpow2.f32 %v1450_v55 }
 0x681   :  { %1699 = vpow2.f32 %v1449_v56 }
 0x688   :  { %v1694_v53 = vpop.eup %1693 }
 0x689   :  { %v1696_v54 = vpop.eup %1695  ;;  %553 = vrot.lane.b32.xlu1 %v1694_v53, %s1825_s17 }
 0x68a   :  { %529 = vrot.lane.b32.xlu0 %v1696_v54, %s1825_s17  ;;  %v1698_v57 = vpop.eup %1697 }
 0x68b   :  { %v1700_v1 = vpop.eup %1699  ;;  %v547_v2 = vadd.f32 1.0, %v1698_v57 }
 0x68c   :  { %v523_v3 = vadd.f32 1.0, %v1700_v1 }
 0x68d   :  { %1701 = vrcp.f32 %v547_v2 }
 0x68e   :  { %1703 = vrcp.f32 %v523_v3 }
 0x697   :  { %v1702_v6 = vpop.eup %1701 }
 0x698   :  { %v1704_v7 = vpop.eup %1703  ;;  %v551_v13 = vmul.f32 %v1702_v6, %v429_v36 }
 0x699   :  { %v527_v17 = vmul.f32 %v1704_v7, %v405_v38 }
 0x6fb   :  { %v554_v59 = vpop.permute.xlu1 %553 }
 0x6fc   :  { %v556_v10 = vmul.f32 %v1702_v6, %v554_v59  ;;  %v530_v11 = vpop.permute.xlu0 %529 }
 0x6fd   :  { %v532_v12 = vmul.f32 %v1704_v7, %v530_v11 }
 0x6fe   :  { %558 = vrot.lane.b32.xlu1 %v556_v10, %s1826_s3 }
 0x6ff   :  { %534 = vrot.lane.b32.xlu0 %v532_v12, %s1826_s3 }
 0x770   :  { %v559_v15 = vpop.permute.xlu1 %558 }
 0x771   :  { %v561_v18 = vadd.f32 %v559_v15, %v551_v13  ;;  %v535_v19 = vpop.permute.xlu0 %534 }
 0x772   :  { %v537_v20 = vadd.f32 %v535_v19, %v527_v17 }
 0x773   :  { %1705 = vtanh.f32 %v561_v18 }
 0x774   :  { %1707 = vtanh.f32 %v537_v20 }
 0x77d   :  { %v1706_v21 = vpop.eup %1705 }
 0x77e   :  { %v1708_v22 = vpop.eup %1707  ;;  %564 = vrot.lane.b32.xlu1 %v1706_v21, %s1825_s17 }
 0x77f   :  { %540 = vrot.lane.b32.xlu0 %v1708_v22, %s1825_s17 }
 0x7f0   :  { %v565_v25 = vpop.permute.xlu1 %564 }
 0x7f1   :  { %v567_v26 = vmul.f32 %v1702_v6, %v565_v25  ;;  %v541_v28 = vpop.permute.xlu0 %540 }
 0x7f2   :  { %v543_v29 = vmul.f32 %v1704_v7, %v541_v28 }
 0x7f3   :  { %573 = vrot.lane.b32.xlu1 %v567_v26, %s1825_s17 }
 0x7f4   :  { %569 = vrot.lane.b32.xlu0 %v543_v29, %s1826_s3 }
 0x865   :  { %v574_v30 = vpop.permute.xlu1 %573 }
 0x866   :  { %v570_v31 = vpop.permute.xlu0 %569 }
 0x867   :  { %v576_v32 = vsel %vm311_vm2, %v570_v31, %v574_v30 }
 0x868   :  { %1451 = vmatmul.mubr.msk.f32.vlgmr.msra.gmra.mrb[10].mxu0 %vm208_vm3, %v576_v32 }
 0x869   :  { %1594 = vmatpush1.bf16.msra.mxu0 %v1877_v8  ;;  %908 = vmatprep.mubr.f32.mxu0 %v1824_v0 }
 0x86a   :  { %1596 = vmatprep.subr.bf16.mxu0 %v1879_v9 }
 0x86d   :  { %1598 = vmatpush1.bf16.msra.mxu0 %v1883_v14 }
 0x86e   :  { %1600 = vmatprep.subr.bf16.mxu0 %v1886_v16 }
 0x871   :  { %1602 = vmatpush1.bf16.msra.mxu0 %v1899_v23 }
 0x872   :  { %1604 = vmatprep.subr.bf16.mxu0 %v1903_v24 }
 0x875   :  { %1606 = vmatpush1.bf16.msra.mxu0 %v1909_v27 }
 0x876   :  { %1624 = vmatprep.subr.bf16.mxu0 %v1875_v4 }
 0x93b   :  { %v646_v33 = vpop.f32.mrb[10].mxu0 }
 0x93c   :  { %v647_v35 = vadd.f32 %v646_v33, %v1941_v34  ;;  %v648_v36 = vpop.f32.mrb[11].mxu0 }
 0x93d   :  { %v649_v37 = vadd.f32 %v648_v36, %v2001_v5 }
 0x93e   :  { %v651_v38 = vadd.f32 %v1976_v58, %v647_v35 }
 0x93f   :  { %1709 = vtanh.f32 %v649_v37  ;;  %v1453_v41 = vmul.f32 -1.442695, %v649_v37 }
 0x940   :  { %1711 = vtanh.f32 %v651_v38  ;;  %v1452_v42 = vmul.f32 -1.442695, %v651_v38 }
 0x941   :  { %1713 = vpow2.f32 %v1453_v41 }
 0x942   :  { %1715 = vpow2.f32 %v1452_v42 }
 0x949   :  { %v1710_v39 = vpop.eup %1709 }
 0x94a   :  { %v1712_v40 = vpop.eup %1711  ;;  %685 = vrot.lane.b32.xlu1 %v1710_v39, %s1825_s17 }
 0x94b   :  { %661 = vrot.lane.b32.xlu0 %v1712_v40, %s1825_s17  ;;  %v1714_v43 = vpop.eup %1713 }
 0x94c   :  { %v1716_v44 = vpop.eup %1715  ;;  %v679_v45 = vadd.f32 1.0, %v1714_v43 }
 0x94d   :  { %v655_v46 = vadd.f32 1.0, %v1716_v44 }
 0x94e   :  { %1717 = vrcp.f32 %v679_v45 }
 0x94f   :  { %1719 = vrcp.f32 %v655_v46 }
 0x958   :  { %v1718_v47 = vpop.eup %1717 }
 0x959   :  { %v1720_v48 = vpop.eup %1719  ;;  %v683_v52 = vmul.f32 %v1718_v47, %v561_v18 }
 0x95a   :  { %v659_v54 = vmul.f32 %v1720_v48, %v537_v20 }
 0x9bc   :  { %v686_v58 = vpop.permute.xlu1 %685 }
 0x9bd   :  { %v688_v49 = vmul.f32 %v1718_v47, %v686_v58  ;;  %v662_v50 = vpop.permute.xlu0 %661 }
 0x9be   :  { %v664_v51 = vmul.f32 %v1720_v48, %v662_v50 }
 0x9bf   :  { %690 = vrot.lane.b32.xlu1 %v688_v49, %s1826_s3 }
 0x9c0   :  { %666 = vrot.lane.b32.xlu0 %v664_v51, %s1826_s3 }
 0xa31   :  { %v691_v53 = vpop.permute.xlu1 %690 }
 0xa32   :  { %v693_v55 = vadd.f32 %v691_v53, %v683_v52  ;;  %v667_v56 = vpop.permute.xlu0 %666 }
 0xa33   :  { %v669_v57 = vadd.f32 %v667_v56, %v659_v54 }
 0xa34   :  { %1721 = vtanh.f32 %v693_v55 }
 0xa35   :  { %1723 = vtanh.f32 %v669_v57 }
 0xa3e   :  { %v1722_v1 = vpop.eup %1721 }
 0xa3f   :  { %v1724_v2 = vpop.eup %1723  ;;  %696 = vrot.lane.b32.xlu1 %v1722_v1, %s1825_s17 }
 0xa40   :  { %672 = vrot.lane.b32.xlu0 %v1724_v2, %s1825_s17 }
 0xab1   :  { %v697_v3 = vpop.permute.xlu1 %696 }
 0xab2   :  { %v699_v6 = vmul.f32 %v1718_v47, %v697_v3  ;;  %v673_v59 = vpop.permute.xlu0 %672 }
 0xab3   :  { %v675_v7 = vmul.f32 %v1720_v48, %v673_v59 }
 0xab4   :  { %705 = vrot.lane.b32.xlu1 %v699_v6, %s1825_s17 }
 0xab5   :  { %701 = vrot.lane.b32.xlu0 %v675_v7, %s1826_s3 }
 0xb26   :  { %v706_v10 = vpop.permute.xlu1 %705 }
 0xb27   :  { %v702_v11 = vpop.permute.xlu0 %701 }
 0xb28   :  { %v708_v12 = vsel %vm311_vm2, %v702_v11, %v706_v10 }
 0xb29   :  { %1454 = vmatmul.mubr.msk.f32.vlgmr.msra.gmra.mrb[4].mxu1 %vm208_vm3, %v708_v12 }
 0xb2a   :  { %1610 = vmatpush1.bf16.msra.mxu1 %v1877_v8  ;;  %1040 = vmatprep.mubr.f32.mxu1 %v1824_v0 }
 0xb2b   :  { %1612 = vmatprep.subr.bf16.mxu1 %v1879_v9 }
 0xb2e   :  { %1614 = vmatpush1.bf16.msra.mxu1 %v1883_v14 }
 0xb2f   :  { %1616 = vmatprep.subr.bf16.mxu1 %v1886_v16 }
 0xb32   :  { %1618 = vmatpush1.bf16.msra.mxu1 %v1899_v23 }
 0xb33   :  { %1620 = vmatprep.subr.bf16.mxu1 %v1903_v24 }
 0xb36   :  { %1622 = vmatpush1.bf16.msra.mxu1 %v1909_v27 }
 0xb37   :  { %1640 = vmatprep.subr.bf16.mxu1 %v1875_v4 }
 0xbfc   :  { %v778_v13 = vpop.f32.mrb[4].mxu1 }
 0xbfd   :  { %v779_v15 = vadd.f32 %v778_v13, %v1941_v34  ;;  %v780_v17 = vpop.f32.mrb[5].mxu1 }
 0xbfe   :  { %v781_v18 = vadd.f32 %v780_v17, %v2001_v5 }
 0xbff   :  { %v783_v19 = vadd.f32 %v779_v15, %v1982_v61 }
 0xc00   :  { %1725 = vtanh.f32 %v781_v18  ;;  %v1456_v22 = vmul.f32 -1.442695, %v781_v18 }
 0xc01   :  { %1727 = vtanh.f32 %v783_v19  ;;  %v1455_v25 = vmul.f32 -1.442695, %v783_v19 }
 0xc02   :  { %1729 = vpow2.f32 %v1456_v22 }
 0xc03   :  { %1731 = vpow2.f32 %v1455_v25 }
 0xc0a   :  { %v1726_v20 = vpop.eup %1725 }
 0xc0b   :  { %v1728_v21 = vpop.eup %1727  ;;  %817 = vrot.lane.b32.xlu1 %v1726_v20, %s1825_s17 }
 0xc0c   :  { %793 = vrot.lane.b32.xlu0 %v1728_v21, %s1825_s17  ;;  %v1730_v4 = vpop.eup %1729 }
 0xc0d   :  { %v1732_v26 = vpop.eup %1731  ;;  %v811_v28 = vadd.f32 1.0, %v1730_v4 }
 0xc0e   :  { %v787_v29 = vadd.f32 1.0, %v1732_v26 }
 0xc0f   :  { %1733 = vrcp.f32 %v811_v28 }
 0xc10   :  { %1735 = vrcp.f32 %v787_v29 }
 0xc19   :  { %v1734_v30 = vpop.eup %1733 }
 0xc1a   :  { %v1736_v31 = vpop.eup %1735  ;;  %v815_v36 = vmul.f32 %v1734_v30, %v693_v55 }
 0xc1b   :  { %v791_v38 = vmul.f32 %v1736_v31, %v669_v57 }
 0xc7d   :  { %v818_v61 = vpop.permute.xlu1 %817 }
 0xc7e   :  { %v820_v32 = vmul.f32 %v1734_v30, %v818_v61  ;;  %v794_v33 = vpop.permute.xlu0 %793 }
 0xc7f   :  { %v796_v35 = vmul.f32 %v1736_v31, %v794_v33 }
 0xc80   :  { %822 = vrot.lane.b32.xlu1 %v820_v32, %s1826_s3 }
 0xc81   :  { %798 = vrot.lane.b32.xlu0 %v796_v35, %s1826_s3 }
 0xcf2   :  { %v823_v37 = vpop.permute.xlu1 %822 }
 0xcf3   :  { %v825_v39 = vadd.f32 %v823_v37, %v815_v36  ;;  %v799_v40 = vpop.permute.xlu0 %798 }
 0xcf4   :  { %v801_v41 = vadd.f32 %v799_v40, %v791_v38 }
 0xcf5   :  { %1737 = vtanh.f32 %v825_v39 }
 0xcf6   :  { %1739 = vtanh.f32 %v801_v41 }
 0xcff   :  { %v1738_v42 = vpop.eup %1737 }
 0xd00   :  { %v1740_v43 = vpop.eup %1739  ;;  %828 = vrot.lane.b32.xlu1 %v1738_v42, %s1825_s17 }
 0xd01   :  { %804 = vrot.lane.b32.xlu0 %v1740_v43, %s1825_s17 }
 0xd72   :  { %v829_v44 = vpop.permute.xlu1 %828 }
 0xd73   :  { %v831_v45 = vmul.f32 %v1734_v30, %v829_v44  ;;  %v805_v46 = vpop.permute.xlu0 %804 }
 0xd74   :  { %v807_v47 = vmul.f32 %v1736_v31, %v805_v46 }
 0xd75   :  { %837 = vrot.lane.b32.xlu1 %v831_v45, %s1825_s17 }
 0xd76   :  { %833 = vrot.lane.b32.xlu0 %v807_v47, %s1826_s3 }
 0xde7   :  { %v838_v58 = vpop.permute.xlu1 %837 }
 0xde8   :  { %v834_v48 = vpop.permute.xlu0 %833 }
 0xde9   :  { %v840_v49 = vsel %vm311_vm2, %v834_v48, %v838_v58 }
 0xdea   :  { %1457 = vmatmul.mubr.msk.f32.vlgmr.msra.gmra.mrb[12].mxu0 %vm208_vm3, %v840_v49 }
 0xdeb   :  { %1626 = vmatpush1.bf16.msra.mxu0 %v1877_v8  ;;  %1172 = vmatprep.mubr.f32.mxu0 %v1824_v0 }
 0xdec   :  { %1628 = vmatprep.subr.bf16.mxu0 %v1879_v9 }
 0xdef   :  { %1630 = vmatpush1.bf16.msra.mxu0 %v1883_v14 }
 0xdf0   :  { %1632 = vmatprep.subr.bf16.mxu0 %v1886_v16 }
 0xdf3   :  { %1634 = vmatpush1.bf16.msra.mxu0 %v1899_v23 }
 0xdf4   :  { %1636 = vmatprep.subr.bf16.mxu0 %v1903_v24 }
 0xdf7   :  { %1638 = vmatpush1.bf16.msra.mxu0 %v1909_v27 }
 0xebd   :  { %v910_v50 = vpop.f32.mrb[12].mxu0 }
 0xebe   :  { %v911_v51 = vadd.f32 %v910_v50, %v1941_v34  ;;  %v912_v52 = vpop.f32.mrb[13].mxu0 }
 0xebf   :  { %v913_v53 = vadd.f32 %v912_v52, %v2001_v5 }
 0xec0   :  { %v915_v54 = vadd.f32 %v1980_v60, %v911_v51 }
 0xec1   :  { %1741 = vtanh.f32 %v913_v53  ;;  %v1459_v57 = vmul.f32 -1.442695, %v913_v53 }
 0xec2   :  { %1743 = vtanh.f32 %v915_v54  ;;  %v1458_v1 = vmul.f32 -1.442695, %v915_v54 }
 0xec3   :  { %1745 = vpow2.f32 %v1459_v57 }
 0xec4   :  { %1747 = vpow2.f32 %v1458_v1 }
 0xecb   :  { %v1742_v55 = vpop.eup %1741 }
 0xecc   :  { %v1744_v56 = vpop.eup %1743  ;;  %949 = vrot.lane.b32.xlu1 %v1742_v55, %s1825_s17 }
 0xecd   :  { %925 = vrot.lane.b32.xlu0 %v1744_v56, %s1825_s17  ;;  %v1746_v2 = vpop.eup %1745 }
 0xece   :  { %v1748_v3 = vpop.eup %1747  ;;  %v943_v6 = vadd.f32 1.0, %v1746_v2 }
 0xecf   :  { %v919_v59 = vadd.f32 1.0, %v1748_v3 }
 0xed0   :  { %1749 = vrcp.f32 %v943_v6 }
 0xed1   :  { %1751 = vrcp.f32 %v919_v59 }
 0xeda   :  { %v1750_v7 = vpop.eup %1749 }
 0xedb   :  { %v1752_v10 = vpop.eup %1751  ;;  %v947_v15 = vmul.f32 %v1750_v7, %v825_v39 }
 0xedc   :  { %v923_v18 = vmul.f32 %v1752_v10, %v801_v41 }
 0xf3e   :  { %v950_v60 = vpop.permute.xlu1 %949 }
 0xf3f   :  { %v952_v11 = vmul.f32 %v1750_v7, %v950_v60  ;;  %v926_v12 = vpop.permute.xlu0 %925 }
 0xf40   :  { %v928_v13 = vmul.f32 %v1752_v10, %v926_v12 }
 0xf41   :  { %954 = vrot.lane.b32.xlu1 %v952_v11, %s1826_s3 }
 0xf42   :  { %930 = vrot.lane.b32.xlu0 %v928_v13, %s1826_s3 }
 0xfb3   :  { %v955_v17 = vpop.permute.xlu1 %954 }
 0xfb4   :  { %v957_v19 = vadd.f32 %v955_v17, %v947_v15  ;;  %v931_v20 = vpop.permute.xlu0 %930 }
 0xfb5   :  { %v933_v21 = vadd.f32 %v931_v20, %v923_v18 }
 0xfb6   :  { %1753 = vtanh.f32 %v957_v19 }
 0xfb7   :  { %1755 = vtanh.f32 %v933_v21 }
 0xfc0   :  { %v1754_v22 = vpop.eup %1753 }
 0xfc1   :  { %v1756_v25 = vpop.eup %1755  ;;  %960 = vrot.lane.b32.xlu1 %v1754_v22, %s1825_s17 }
 0xfc2   :  { %936 = vrot.lane.b32.xlu0 %v1756_v25, %s1825_s17 }
0x1033   :  { %v961_v4 = vpop.permute.xlu1 %960 }
0x1034   :  { %v963_v26 = vmul.f32 %v1750_v7, %v961_v4  ;;  %v937_v28 = vpop.permute.xlu0 %936 }
0x1035   :  { %v939_v29 = vmul.f32 %v1752_v10, %v937_v28 }
0x1036   :  { %969 = vrot.lane.b32.xlu1 %v963_v26, %s1825_s17 }
0x1037   :  { %965 = vrot.lane.b32.xlu0 %v939_v29, %s1826_s3 }
0x10a8   :  { %v970_v30 = vpop.permute.xlu1 %969 }
0x10a9   :  { %v966_v61 = vpop.permute.xlu0 %965 }
0x10aa   :  { %v972_v31 = vsel %vm311_vm2, %v966_v61, %v970_v30 }
0x10ab   :  { %1460 = vmatmul.mubr.msk.f32.vlgmr.msra.gmra.mrb[6].mxu1 %vm208_vm3, %v972_v31 }
0x10ac   :  { %1642 = vmatpush1.bf16.msra.mxu1 %v1877_v8  ;;  %1304 = vmatprep.mubr.f32.mxu1 %v1824_v0 }
0x10ad   :  { %1644 = vmatprep.subr.bf16.mxu1 %v1879_v9 }
0x10b0   :  { %1646 = vmatpush1.bf16.msra.mxu1 %v1883_v14 }
0x10b1   :  { %1648 = vmatprep.subr.bf16.mxu1 %v1886_v16 }
0x10b4   :  { %1650 = vmatpush1.bf16.msra.mxu1 %v1899_v23 }
0x10b5   :  { %1652 = vmatprep.subr.bf16.mxu1 %v1903_v24 }
0x10b8   :  { %1654 = vmatpush1.bf16.msra.mxu1 %v1909_v27 }
0x117e   :  { %v1042_v32 = vpop.f32.mrb[6].mxu1 }
0x117f   :  { %v1043_v33 = vadd.f32 %v1042_v32, %v1941_v34  ;;  %v1044_v35 = vpop.f32.mrb[7].mxu1 }
0x1180   :  { %v1045_v8 = vadd.f32 %v1044_v35, %v2001_v5 }
0x1181   :  { %v1047_v0 = vadd.f32 %v1043_v33, %v1986_v63 }
0x1182   :  { %1757 = vtanh.f32 %v1045_v8  ;;  %v1462_v16 = vmul.f32 -1.442695, %v1045_v8 }
0x1183   :  { %1759 = vtanh.f32 %v1047_v0  ;;  %v1461_v23 = vmul.f32 -1.442695, %v1047_v0 }
0x1184   :  { %1761 = vpow2.f32 %v1462_v16 }
0x1185   :  { %1763 = vpow2.f32 %v1461_v23 }
0x118c   :  { %v1758_v9 = vpop.eup %1757 }
0x118d   :  { %v1760_v14 = vpop.eup %1759  ;;  %1081 = vrot.lane.b32.xlu1 %v1758_v9, %s1825_s17 }
0x118e   :  { %1057 = vrot.lane.b32.xlu0 %v1760_v14, %s1825_s17  ;;  %v1762_v24 = vpop.eup %1761 }
0x118f   :  { %v1764_v27 = vpop.eup %1763  ;;  %v1075_v36 = vadd.f32 1.0, %v1762_v24 }
0x1190   :  { %v1051_v37 = vadd.f32 1.0, %v1764_v27 }
0x1191   :  { %1765 = vrcp.f32 %v1075_v36 }
0x1192   :  { %1767 = vrcp.f32 %v1051_v37 }
0x119b   :  { %v1766_v38 = vpop.eup %1765 }
0x119c   :  { %v1768_v39 = vpop.eup %1767  ;;  %v1079_v43 = vmul.f32 %v1766_v38, %v957_v19 }
0x119d   :  { %v1055_v45 = vmul.f32 %v1768_v39, %v933_v21 }
0x11ff   :  { %v1082_v63 = vpop.permute.xlu1 %1081 }
0x1200   :  { %v1084_v40 = vmul.f32 %v1766_v38, %v1082_v63  ;;  %v1058_v41 = vpop.permute.xlu0 %1057 }
0x1201   :  { %v1060_v42 = vmul.f32 %v1768_v39, %v1058_v41 }
0x1202   :  { %1086 = vrot.lane.b32.xlu1 %v1084_v40, %s1826_s3 }
0x1203   :  { %1062 = vrot.lane.b32.xlu0 %v1060_v42, %s1826_s3  ;;  %v1335_v42 = vld [vmem:[%s2170_s4 + $0x8] sm:$0xff] }
0x1274   :  { %v1087_v44 = vpop.permute.xlu1 %1086 }
0x1275   :  { %v1089_v46 = vadd.f32 %v1087_v44, %v1079_v43  ;;  %v1063_v47 = vpop.permute.xlu0 %1062  ;;  %v1336_v43 = vld [vmem:[%s2170_s4 + $0x10] sm:$0xff] }
0x1276   :  { %v1065_v58 = vadd.f32 %v1063_v47, %v1055_v45  ;;  %v1337_v45 = vld [vmem:[%s2170_s4 + $0x18] sm:$0xff] }
0x1277   :  { %1769 = vtanh.f32 %v1089_v46 }
0x1278   :  { %1771 = vtanh.f32 %v1065_v58 }
0x1281   :  { %v1770_v48 = vpop.eup %1769 }
0x1282   :  { %v1772_v49 = vpop.eup %1771  ;;  %1092 = vrot.lane.b32.xlu1 %v1770_v48, %s1825_s17 }
0x1283   :  { %1068 = vrot.lane.b32.xlu0 %v1772_v49, %s1825_s17 }
0x12f4   :  { %v1093_v50 = vpop.permute.xlu1 %1092 }
0x12f5   :  { %v1095_v51 = vmul.f32 %v1766_v38, %v1093_v50  ;;  %v1069_v52 = vpop.permute.xlu0 %1068  ;;  %v1468_v50 = vld [vmem:[%s2171_s5] ss:$0 sm:$0xff] }
0x12f6   :  { %v1071_v53 = vmul.f32 %v1768_v39, %v1069_v52 }
0x12f7   :  { %1101 = vrot.lane.b32.xlu1 %v1095_v51, %s1825_s17 }
0x12f8   :  { %1097 = vrot.lane.b32.xlu0 %v1071_v53, %s1826_s3 }
0x1369   :  { %v1102_v54 = vpop.permute.xlu1 %1101 }
0x136a   :  { %v1098_v55 = vpop.permute.xlu0 %1097 }
0x136b   :  { %v1104_v56 = vsel %vm311_vm2, %v1098_v55, %v1102_v54 }
0x136c   :  { %1463 = vmatmul.mubr.msk.f32.vlgmr.msra.gmra.mrb[14].mxu0 %vm208_vm3, %v1104_v56 }
0x143f   :  { %v1174_v57 = vpop.f32.mrb[14].mxu0 }
0x1440   :  { %v1175_v1 = vadd.f32 %v1174_v57, %v1941_v34  ;;  %v1176_v2 = vpop.f32.mrb[15].mxu0 }
0x1441   :  { %v1177_v3 = vadd.f32 %v1176_v2, %v2001_v5 }
0x1442   :  { %v1179_v6 = vadd.f32 %v1984_v62, %v1175_v1 }
0x1443   :  { %1773 = vtanh.f32 %v1177_v3  ;;  %v1465_v60 = vmul.f32 -1.442695, %v1177_v3 }
0x1444   :  { %1775 = vtanh.f32 %v1179_v6  ;;  %v1464_v10 = vmul.f32 -1.442695, %v1179_v6 }
0x1445   :  { %1777 = vpow2.f32 %v1465_v60 }
0x1446   :  { %1779 = vpow2.f32 %v1464_v10 }
0x144d   :  { %v1774_v59 = vpop.eup %1773 }
0x144e   :  { %v1776_v7 = vpop.eup %1775  ;;  %1213 = vrot.lane.b32.xlu1 %v1774_v59, %s1825_s17 }
0x144f   :  { %1189 = vrot.lane.b32.xlu0 %v1776_v7, %s1825_s17  ;;  %v1778_v11 = vpop.eup %1777 }
0x1450   :  { %v1780_v12 = vpop.eup %1779  ;;  %v1207_v34 = vadd.f32 1.0, %v1778_v11 }
0x1451   :  { %v1183_v13 = vadd.f32 1.0, %v1780_v12 }
0x1452   :  { %1781 = vrcp.f32 %v1207_v34 }
0x1453   :  { %1783 = vrcp.f32 %v1183_v13 }
0x145c   :  { %v1782_v15 = vpop.eup %1781 }
0x145d   :  { %v1784_v17 = vpop.eup %1783  ;;  %v1211_v21 = vmul.f32 %v1782_v15, %v1089_v46  ;;  %v1659_v46 = vpack.c.bf16 %v1337_v45, %v1336_v43 }
0x145e   :  { %v1187_v25 = vmul.f32 %v1784_v17, %v1065_v58 }
0x14c0   :  { %v1214_v62 = vpop.permute.xlu1 %1213 }
0x14c1   :  { %v1216_v18 = vmul.f32 %v1782_v15, %v1214_v62  ;;  %v1190_v19 = vpop.permute.xlu0 %1189 }
0x14c2   :  { %v1192_v20 = vmul.f32 %v1784_v17, %v1190_v19 }
0x14c3   :  { %1218 = vrot.lane.b32.xlu1 %v1216_v18, %s1826_s3 }
0x14c4   :  { %1194 = vrot.lane.b32.xlu0 %v1192_v20, %s1826_s3 }
0x1535   :  { %v1219_v22 = vpop.permute.xlu1 %1218 }
0x1536   :  { %v1221_v4 = vadd.f32 %v1219_v22, %v1211_v21  ;;  %v1195_v26 = vpop.permute.xlu0 %1194 }
0x1537   :  { %v1197_v28 = vadd.f32 %v1195_v26, %v1187_v25 }
0x1538   :  { %1785 = vtanh.f32 %v1221_v4 }
0x1539   :  { %1787 = vtanh.f32 %v1197_v28 }
0x1542   :  { %v1786_v29 = vpop.eup %1785 }
0x1543   :  { %v1788_v30 = vpop.eup %1787  ;;  %1224 = vrot.lane.b32.xlu1 %v1786_v29, %s1825_s17 }
0x1544   :  { %1200 = vrot.lane.b32.xlu0 %v1788_v30, %s1825_s17 }
0x15b5   :  { %v1225_v61 = vpop.permute.xlu1 %1224 }
0x15b6   :  { %v1227_v31 = vmul.f32 %v1782_v15, %v1225_v61  ;;  %v1201_v32 = vpop.permute.xlu0 %1200 }
0x15b7   :  { %v1203_v33 = vmul.f32 %v1784_v17, %v1201_v32 }
0x15b8   :  { %1233 = vrot.lane.b32.xlu1 %v1227_v31, %s1825_s17 }
0x15b9   :  { %1229 = vrot.lane.b32.xlu0 %v1203_v33, %s1826_s3 }
0x162a   :  { %v1234_v35 = vpop.permute.xlu1 %1233 }
0x162b   :  { %v1230_v8 = vpop.permute.xlu0 %1229 }
0x162c   :  { %v1236_v0 = vsel %vm311_vm2, %v1230_v8, %v1234_v35  ;;  %1508 = vmatprep.mubr.msk.f32.mxu0 %vm311_vm2, %v1230_v8 }
0x162d   :  { %1466 = vmatmul.mubr.msk.f32.vlgmr.msra.gmra.mrb[8].mxu1 %vm208_vm3, %v1236_v0 }
0x1700   :  { %v1306_v9 = vpop.f32.mrb[8].mxu1 }
0x1701   :  { %v1307_v14 = vpop.f32.mrb[9].mxu1 }
0x1702   :  { %v1308_v16 = vadd.f32 %v1307_v14, %v2001_v5  ;;  %v1334_v5 = vld [vmem:[%s2170_s4] sm:$0xff] }
0x1703   :  { %v1655_v44 = vpack.c.bf16 %v1335_v42, %v1334_v5 }
0x1704   :  { %1789 = vtanh.f32 %v1308_v16  ;;  %v1467_v24 = vmul.f32 -1.442695, %v1308_v16 }
0x1705   :  { %1656 = vmatprep.subr.bf16.mxu0 %v1655_v44 }
0x1706   :  { %1791 = vpow2.f32 %v1467_v24  ;;  %1658 = vmatpush3.bf16.msra.mxu0 %v1655_v44 }
0x1707   :  { %1660 = vmatprep.subr.bf16.mxu0 %v1659_v46 }
0x170a   :  { %1662 = vmatpush3.bf16.msra.mxu0 %v1659_v46 }
0x170e   :  { %v1790_v23 = vpop.eup %1789 }
0x170f   :  { %1319 = vrot.lane.b32.xlu0 %v1790_v23, %s1825_s17 }
0x1710   :  { %v1792_v27 = vpop.eup %1791 }
0x1711   :  { %v1313_v36 = vadd.f32 1.0, %v1792_v27 }
0x1713   :  { %1793 = vrcp.f32 %v1313_v36 }
0x171d   :  { %v1794_v37 = vpop.eup %1793 }
0x171e   :  { %v1317_v39 = vmul.f32 %v1794_v37, %v1221_v4 }
0x1781   :  { %v1320_v38 = vpop.permute.xlu0 %1319 }
0x1782   :  { %v1322_v63 = vmul.f32 %v1794_v37, %v1320_v38 }
0x1784   :  { %1324 = vrot.lane.b32.xlu1 %v1322_v63, %s1826_s3 }
0x17f6   :  { %v1325_v40 = vpop.permute.xlu1 %1324 }
0x17f7   :  { %v1327_v41 = vadd.f32 %v1325_v40, %v1317_v39 }
0x17f9   :  { %1795 = vtanh.f32 %v1327_v41 }
0x1803   :  { %v1796_v47 = vpop.eup %1795 }
0x1804   :  { %1330 = vrot.lane.b32.xlu0 %v1796_v47, %s1825_s17 }
0x1876   :  { %v1331_v58 = vpop.permute.xlu0 %1330 }
0x1877   :  { %v1333_v48 = vmul.f32 %v1794_v37, %v1331_v58 }
0x1879   :  { %1346 = vrot.lane.b32.xlu1 %v1333_v48, %s1826_s3 }
0x18eb   :  { %v1347_v49 = vpop.permute.xlu1 %1346 }
0x18ec   :  { %1509 = vmatmul.mubr.msk.f32.vlgmr.msra.gmra.mrb[16].mxu0 %vm311_vm2, %v1347_v49 }
0x19bf   :  { %v1510_v51 = vpop.f32.mrb[16].mxu0 }
0x19c0   :  { %v1424_v52 = vadd.f32 %v1510_v51, %v1468_v50  ;;  %v1418_v53 = vpop.f32.mrb[17].mxu0 }
0x19c1   :  { %v1419_v54 = vadd.f32 %v1468_v50, %v1418_v53 }
0x19c2   :  { %1429 = vst.msk [vmem:[%s2172_s6 + $0x8] sm:$0xff] %vm1427_vm4, %v1424_v52 }
0x19c3   :  { %1428 = vst.msk [vmem:[%s2172_s6] sm:$0xff] %vm1427_vm4, %v1419_v54 }
0x19c4   :  { %1434 = vsyncpa [#allocation3], 1 }

</bundles_post_ra>
